<compile_context>
chip_gen: v5e
topology: v5e:2x2
jax: 0.10.0
libtpu: 0.0.40
codegen_flags: <defaults>
</compile_context>

<pallas_src>
import numpy as np
import jax
import jax.numpy as jnp
from jax.experimental import pallas as pl
from jax.experimental.pallas import tpu as pltpu  # noqa: F401  (TPU backend)

IMGSIZE = 16
NZ = 8            # opts.hiddenz_size
NCLASS = 4        # opts.n_class
C1 = 8            # encoder/decoder hidden channels
C2 = 16           # bottleneck channels
LANE = 128        # lane-dense padding width

P0 = IMGSIZE * IMGSIZE                  # 256 pixels at 16x16
P1 = (IMGSIZE // 2) * (IMGSIZE // 2)    # 64  pixels at 8x8
P2 = (IMGSIZE // 4) * (IMGSIZE // 4)    # 16  pixels at 4x4


# ---------------------------------------------------------------------------
# Host-side structural matrices + weight folding (built once at init)
# ---------------------------------------------------------------------------
def _conv_shift_matrices(hin, win, stride, k=3, pad=1):
    """Per-tap gather matrices s[t][p_in, p_out] for a 3x3 conv (zero pad)."""
    hout = (hin + 2 * pad - k) // stride + 1
    wout = (win + 2 * pad - k) // stride + 1
    m = np.zeros((k * k, hin * win, hout * wout), np.float32)
    for dh in range(k):
        for dw in range(k):
            t = dh * k + dw
            for oy in range(hout):
                for ox in range(wout):
                    iy = oy * stride + dh - pad
                    ix = ox * stride + dw - pad
                    if 0 <= iy < hin and 0 <= ix < win:
                        m[t, iy * win + ix, oy * wout + ox] = 1.0
    return m


def _upsample_matrix(h, w):
    """u[p_in, p_out] for 2x nearest-neighbour upsample (h,w) -> (2h,2w)."""
    m = np.zeros((h * w, (2 * h) * (2 * w)), np.float32)
    for oy in range(2 * h):
        for ox in range(2 * w):
            m[(oy // 2) * w + (ox // 2), oy * (2 * w) + ox] = 1.0
    return m


def _fold_conv(w_taps, shifts):
    """Fold per-tap conv weights + shift matrices into one im2col GEMM matrix.

    w_taps: (9, Cout, Cin); shifts: (9, Pin, Pout)
    returns (Cin*Pin, Cout*Pout), channel-major flatten on both sides.
    """
    W = np.einsum('toc,tip->cipo', w_taps, shifts)      # (Cin, Pin, Cout, Pout)
    cin, pin, cout, pout = W.shape
    return W.reshape(cin * pin, cout * pout).astype(np.float32)


# Order of the weight inputs fed to the kernel.
_PARAM_KEYS = ("w1", "b1", "w2", "b2", "we", "be",
               "wzl", "wgr", "bg", "w3a", "w3b", "b3", "w4", "b4")


def init_params(key):
    ks = jax.random.split(key, 6)
    s = 0.05
    npf = np.float32

    # per-tap conv weights (host numpy, for folding)
    w1 = np.asarray(s * jax.random.normal(ks[0], (9, C1, 1)), npf)
    w2 = np.asarray(s * jax.random.normal(ks[1], (9, C2, C1)), npf)
    w3 = np.asarray(s * jax.random.normal(ks[2], (9, C1, 2 * C2)), npf)
    w4 = np.asarray(s * jax.random.normal(ks[3], (9, 1, C1)), npf)
    e_fc = np.asarray(s * jax.random.normal(ks[4], (C2 * P2, NZ)), npf)
    g_fc = np.asarray(s * jax.random.normal(ks[5], (2 * NZ + NCLASS, C2 * P2)), npf)

    # shift / upsample structural matrices
    s1 = _conv_shift_matrices(IMGSIZE, IMGSIZE, 2)            # (9, 256, 64)
    s2 = _conv_shift_matrices(IMGSIZE // 2, IMGSIZE // 2, 2)  # (9, 64, 16)
    s3 = _conv_shift_matrices(IMGSIZE // 2, IMGSIZE // 2, 1)  # (9, 64, 64)
    s4 = _conv_shift_matrices(IMGSIZE, IMGSIZE, 1)            # (9, 256, 256)
    u1 = _upsample_matrix(IMGSIZE // 4, IMGSIZE // 4)         # (16, 64)
    u2 = _upsample_matrix(IMGSIZE // 2, IMGSIZE // 2)         # (64, 256)

    # --- encoder convs folded into single GEMMs ---
    W1 = _fold_conv(w1, s1)                                   # (256, 512)
    W2 = _fold_conv(w2, s2)                                   # (512, 256)

    # --- generator g_conv1: upsample (block-diag kron) composed into conv ---
    U1 = np.kron(np.eye(C2, dtype=npf), u1)                   # (256, 1024)
    W3a = U1 @ _fold_conv(w3[:, :, :C2], s3)                  # g-branch  (256, 512)
    W3b = U1 @ _fold_conv(w3[:, :, C2:], s3)                  # skip/down (256, 512)

    # --- generator g_conv2: upsample composed into final conv ---
    U2 = np.kron(np.eye(C1, dtype=npf), u2)                   # (512, 2048)
    W4 = U2 @ _fold_conv(w4, s4)                              # (512, 256)

    # --- encoder FC (flatten channel-major -> nz), lane-dense padded to 128 ---
    We = np.zeros((C2 * P2, LANE), npf)
    We[:, :NZ] = e_fc                                         # (256, 128)

    # --- generator FC on concat(z_random, z_r1, label), split + lane-packed ---
    Wzl = np.zeros((LANE, C2 * P2), npf)                      # acts on packed [z|label] row
    Wzl[:NZ] = g_fc[:NZ]                                      # z_random rows
    Wzl[NZ:NZ + NCLASS] = g_fc[2 * NZ:]                       # label rows
    Wgr = np.zeros((LANE, C2 * P2), npf)                      # acts on padded z_r1 row
    Wgr[:NZ] = g_fc[NZ:2 * NZ]

    bf16, f32 = jnp.bfloat16, jnp.float32
    return {
        "w1": jnp.asarray(W1, bf16), "b1": jnp.zeros((1, C1 * P1), f32),
        "w2": jnp.asarray(W2, bf16), "b2": jnp.zeros((1, C2 * P2), f32),
        "we": jnp.asarray(We, bf16), "be": jnp.zeros((1, LANE), f32),
        "wzl": jnp.asarray(Wzl, bf16), "wgr": jnp.asarray(Wgr, bf16),
        "bg": jnp.zeros((1, C2 * P2), f32),
        "w3a": jnp.asarray(W3a, bf16), "w3b": jnp.asarray(W3b, bf16),
        "b3": jnp.zeros((1, C1 * P1), f32),
        "w4": jnp.asarray(W4, bf16), "b4": jnp.zeros((1, P0), f32),
    }


# ---------------------------------------------------------------------------
# The single fused Pallas kernel: whole batch, whole E->G network, no grid
# ---------------------------------------------------------------------------
def _divco_kernel(x_ref, zl_ref,
                  w1_ref, b1_ref, w2_ref, b2_ref, we_ref, be_ref,
                  wzl_ref, wgr_ref, bg_ref,
                  w3a_ref, w3b_ref, b3_ref, w4_ref, b4_ref,
                  fake_ref, zr_ref):
    bf16, f32 = jnp.bfloat16, jnp.float32

    def mm(a, b):  # bf16 operands, f32 accumulation on the MXU
        return jnp.dot(a, b, preferred_element_type=f32)

    def leaky(v):
        return jnp.where(v >= 0.0, v, 0.2 * v)

    x = x_ref[...]                      # (B, 256)  bf16 ref-image rows
    zl = zl_ref[...]                    # (B, 128)  bf16 packed [z_random | label]

    # ------------------ Encoder E ------------------
    h1 = leaky(mm(x, w1_ref[...]) + b1_ref[...]).astype(bf16)        # conv1  (B, 512)
    h2 = leaky(mm(h1, w2_ref[...]) + b2_ref[...]).astype(bf16)       # conv2  (B, 256)
    zr = mm(h2, we_ref[...]) + be_ref[...]                           # e_fc   (B, 128) f32
    zr_ref[...] = zr                                                 # lane-dense store
    zr_b = zr.astype(bf16)

    # ------------------ Generator G ------------------
    # g_fc on concat(z_random, z_r1, label) via split weights (no in-kernel concat)
    g = leaky(mm(zl, wzl_ref[...]) + mm(zr_b, wgr_ref[...])
              + bg_ref[...]).astype(bf16)                            # (B, 256)
    # g_conv1 on concat([upsample(g), upsample(down)]) -- upsample folded into weights
    h3 = leaky(mm(g, w3a_ref[...]) + mm(h2, w3b_ref[...])
               + b3_ref[...]).astype(bf16)                           # (B, 512)
    # g_conv2 on upsample(h3), tanh output image rows
    fake_ref[...] = jnp.tanh(mm(h3, w4_ref[...]) + b4_ref[...])      # (B, 256) f32


# ---------------------------------------------------------------------------
# Wrapper: DivCo_PLGAN.forward
# ---------------------------------------------------------------------------
def divco_plgan_forward(params, image_nchw, label_one_hot, z_key):
    """image_nchw: (B, 2, H, W); label_one_hot: (B, n_class).

    Returns fake_image1 (B, 1, H, W), z_r1 (B, nz), z_random (B, nz)."""
    B = image_nchw.shape[0]

    # real / ref split (as in update()); channel 0 is the reference image
    ref_rows = image_nchw[:, 0, :, :].reshape(B, P0).astype(jnp.bfloat16)

    # get_z_random + label, packed into one lane-dense 128-wide row
    z_random = jax.random.normal(z_key, (B, NZ), jnp.float32)
    zl = jnp.zeros((B, LANE), jnp.float32)
    zl = zl.at[:, :NZ].set(z_random)
    zl = zl.at[:, NZ:NZ + NCLASS].set(label_one_hot.astype(jnp.float32))
    zl = zl.astype(jnp.bfloat16)

    shared = [params[k] for k in _PARAM_KEYS]

    fake_rows, zr_pad = pl.pallas_call(
        _divco_kernel,
        out_shape=(jax.ShapeDtypeStruct((B, P0), jnp.float32),
                   jax.ShapeDtypeStruct((B, LANE), jnp.float32)),
    )(ref_rows, zl, *shared)

    fake_image1 = fake_rows.reshape(B, 1, IMGSIZE, IMGSIZE)
    z_r1 = zr_pad[:, :NZ]
    return fake_image1, z_r1, z_random


# ---------------------------------------------------------------------------
if __name__ == "__main__":
    B = 2

    root = jax.random.PRNGKey(0)
    k_param, k_img, k_lab, k_z = jax.random.split(root, 4)

    params = init_params(k_param)

    # image: (B, 2, H, W) -- channel 0 = ref_image, channel 1 = real_image
    image = jax.random.normal(k_img, (B, 2, IMGSIZE, IMGSIZE), jnp.float32)
    label_idx = jax.random.randint(k_lab, (B,), 0, NCLASS)
    label_one_hot = jax.nn.one_hot(label_idx, NCLASS, dtype=jnp.float32)

    fwd = jax.jit(divco_plgan_forward)
    fake_image1, z_r1, z_random = fwd(params, image, label_one_hot, k_z)
    jax.block_until_ready((fake_image1, z_r1, z_random))

    assert fake_image1.shape == (B, 1, IMGSIZE, IMGSIZE)
    assert z_r1.shape == (B, NZ)
    assert z_random.shape == (B, NZ)
    assert bool(jnp.all(jnp.isfinite(fake_image1)))
    assert bool(jnp.all(jnp.isfinite(z_r1)))
    print("KERNEL_OK")
</pallas_src>

<mosaic_0001>
module attributes {stable_mosaic.version = 11 : i64} {
  func.func @_divco_kernel(%arg0: memref<2x256xbf16, #tpu.memory_space<vmem>>, %arg1: memref<2x128xbf16, #tpu.memory_space<vmem>>, %arg2: memref<256x512xbf16, #tpu.memory_space<vmem>>, %arg3: memref<1x512xf32, #tpu.memory_space<vmem>>, %arg4: memref<512x256xbf16, #tpu.memory_space<vmem>>, %arg5: memref<1x256xf32, #tpu.memory_space<vmem>>, %arg6: memref<256x128xbf16, #tpu.memory_space<vmem>>, %arg7: memref<1x128xf32, #tpu.memory_space<vmem>>, %arg8: memref<128x256xbf16, #tpu.memory_space<vmem>>, %arg9: memref<128x256xbf16, #tpu.memory_space<vmem>>, %arg10: memref<1x256xf32, #tpu.memory_space<vmem>>, %arg11: memref<256x512xbf16, #tpu.memory_space<vmem>>, %arg12: memref<256x512xbf16, #tpu.memory_space<vmem>>, %arg13: memref<1x512xf32, #tpu.memory_space<vmem>>, %arg14: memref<512x256xbf16, #tpu.memory_space<vmem>>, %arg15: memref<1x256xf32, #tpu.memory_space<vmem>>, %arg16: memref<2x256xf32, #tpu.memory_space<vmem>>, %arg17: memref<2x128xf32, #tpu.memory_space<vmem>>) attributes {dimension_semantics = [], scalar_prefetch = 0 : i64, scratch_operands = 0 : i64, tpu.core_type = #tpu.core_type<tc>} {
    %c0 = arith.constant 0 : index
    %c0_0 = arith.constant 0 : index
    %0 = vector.load %arg0[%c0, %c0_0] : memref<2x256xbf16, #tpu.memory_space<vmem>>, vector<2x256xbf16>
    %c0_1 = arith.constant 0 : index
    %c0_2 = arith.constant 0 : index
    %1 = vector.load %arg1[%c0_1, %c0_2] : memref<2x128xbf16, #tpu.memory_space<vmem>>, vector<2x128xbf16>
    %c0_3 = arith.constant 0 : index
    %c0_4 = arith.constant 0 : index
    %2 = vector.load %arg2[%c0_3, %c0_4] : memref<256x512xbf16, #tpu.memory_space<vmem>>, vector<256x512xbf16>
    %cst = arith.constant dense<0.000000e+00> : vector<2x512xf32>
    %3 = tpu.matmul %0, %2, %cst {dimension_numbers = #tpu.dot_dimension_numbers<[1], [0], [0], [1], [0, 0, 1, 1], [], []>} : vector<2x256xbf16>, vector<256x512xbf16>, vector<2x512xf32> -> vector<2x512xf32>
    %c0_5 = arith.constant 0 : index
    %c0_6 = arith.constant 0 : index
    %4 = vector.load %arg3[%c0_5, %c0_6] : memref<1x512xf32, #tpu.memory_space<vmem>>, vector<1x512xf32>
    %5 = vector.broadcast %4 : vector<1x512xf32> to vector<2x512xf32>
    %6 = arith.addf %3, %5 : vector<2x512xf32>
    %cst_7 = arith.constant 0.000000e+00 : f32
    %7 = vector.broadcast %cst_7 : f32 to vector<2x512xf32>
    %8 = arith.cmpf oge, %6, %7 : vector<2x512xf32>
    %cst_8 = arith.constant 2.000000e-01 : f32
    %9 = vector.broadcast %cst_8 : f32 to vector<2x512xf32>
    %10 = arith.mulf %9, %6 : vector<2x512xf32>
    %11 = arith.select %8, %6, %10 : vector<2x512xi1>, vector<2x512xf32>
    %12 = arith.truncf %11 : vector<2x512xf32> to vector<2x512xbf16>
    %c0_9 = arith.constant 0 : index
    %c0_10 = arith.constant 0 : index
    %13 = vector.load %arg4[%c0_9, %c0_10] : memref<512x256xbf16, #tpu.memory_space<vmem>>, vector<512x256xbf16>
    %cst_11 = arith.constant dense<0.000000e+00> : vector<2x256xf32>
    %14 = tpu.matmul %12, %13, %cst_11 {dimension_numbers = #tpu.dot_dimension_numbers<[1], [0], [0], [1], [0, 0, 1, 1], [], []>} : vector<2x512xbf16>, vector<512x256xbf16>, vector<2x256xf32> -> vector<2x256xf32>
    %c0_12 = arith.constant 0 : index
    %c0_13 = arith.constant 0 : index
    %15 = vector.load %arg5[%c0_12, %c0_13] : memref<1x256xf32, #tpu.memory_space<vmem>>, vector<1x256xf32>
    %16 = vector.broadcast %15 : vector<1x256xf32> to vector<2x256xf32>
    %17 = arith.addf %14, %16 : vector<2x256xf32>
    %cst_14 = arith.constant 0.000000e+00 : f32
    %18 = vector.broadcast %cst_14 : f32 to vector<2x256xf32>
    %19 = arith.cmpf oge, %17, %18 : vector<2x256xf32>
    %cst_15 = arith.constant 2.000000e-01 : f32
    %20 = vector.broadcast %cst_15 : f32 to vector<2x256xf32>
    %21 = arith.mulf %20, %17 : vector<2x256xf32>
    %22 = arith.select %19, %17, %21 : vector<2x256xi1>, vector<2x256xf32>
    %23 = arith.truncf %22 : vector<2x256xf32> to vector<2x256xbf16>
    %c0_16 = arith.constant 0 : index
    %c0_17 = arith.constant 0 : index
    %24 = vector.load %arg6[%c0_16, %c0_17] : memref<256x128xbf16, #tpu.memory_space<vmem>>, vector<256x128xbf16>
    %cst_18 = arith.constant dense<0.000000e+00> : vector<2x128xf32>
    %25 = tpu.matmul %23, %24, %cst_18 {dimension_numbers = #tpu.dot_dimension_numbers<[1], [0], [0], [1], [0, 0, 1, 1], [], []>} : vector<2x256xbf16>, vector<256x128xbf16>, vector<2x128xf32> -> vector<2x128xf32>
    %c0_19 = arith.constant 0 : index
    %c0_20 = arith.constant 0 : index
    %26 = vector.load %arg7[%c0_19, %c0_20] : memref<1x128xf32, #tpu.memory_space<vmem>>, vector<1x128xf32>
    %27 = vector.broadcast %26 : vector<1x128xf32> to vector<2x128xf32>
    %28 = arith.addf %25, %27 : vector<2x128xf32>
    %c0_21 = arith.constant 0 : index
    %c0_22 = arith.constant 0 : index
    %29 = vector.load %arg17[%c0_21, %c0_22] : memref<2x128xf32, #tpu.memory_space<vmem>>, vector<2x128xf32>
    tpu.vector_store %arg17[%c0_21, %c0_22], %28 {strides = array<i32>} : memref<2x128xf32, #tpu.memory_space<vmem>>, vector<2x128xf32>,
    %30 = arith.truncf %28 : vector<2x128xf32> to vector<2x128xbf16>
    %c0_23 = arith.constant 0 : index
    %c0_24 = arith.constant 0 : index
    %31 = vector.load %arg8[%c0_23, %c0_24] : memref<128x256xbf16, #tpu.memory_space<vmem>>, vector<128x256xbf16>
    %cst_25 = arith.constant dense<0.000000e+00> : vector<2x256xf32>
    %32 = tpu.matmul %1, %31, %cst_25 {dimension_numbers = #tpu.dot_dimension_numbers<[1], [0], [0], [1], [0, 0, 1, 1], [], []>} : vector<2x128xbf16>, vector<128x256xbf16>, vector<2x256xf32> -> vector<2x256xf32>
    %c0_26 = arith.constant 0 : index
    %c0_27 = arith.constant 0 : index
    %33 = vector.load %arg9[%c0_26, %c0_27] : memref<128x256xbf16, #tpu.memory_space<vmem>>, vector<128x256xbf16>
    %cst_28 = arith.constant dense<0.000000e+00> : vector<2x256xf32>
    %34 = tpu.matmul %30, %33, %cst_28 {dimension_numbers = #tpu.dot_dimension_numbers<[1], [0], [0], [1], [0, 0, 1, 1], [], []>} : vector<2x128xbf16>, vector<128x256xbf16>, vector<2x256xf32> -> vector<2x256xf32>
    %35 = arith.addf %32, %34 : vector<2x256xf32>
    %c0_29 = arith.constant 0 : index
    %c0_30 = arith.constant 0 : index
    %36 = vector.load %arg10[%c0_29, %c0_30] : memref<1x256xf32, #tpu.memory_space<vmem>>, vector<1x256xf32>
    %37 = vector.broadcast %36 : vector<1x256xf32> to vector<2x256xf32>
    %38 = arith.addf %35, %37 : vector<2x256xf32>
    %cst_31 = arith.constant 0.000000e+00 : f32
    %39 = vector.broadcast %cst_31 : f32 to vector<2x256xf32>
    %40 = arith.cmpf oge, %38, %39 : vector<2x256xf32>
    %cst_32 = arith.constant 2.000000e-01 : f32
    %41 = vector.broadcast %cst_32 : f32 to vector<2x256xf32>
    %42 = arith.mulf %41, %38 : vector<2x256xf32>
    %43 = arith.select %40, %38, %42 : vector<2x256xi1>, vector<2x256xf32>
    %44 = arith.truncf %43 : vector<2x256xf32> to vector<2x256xbf16>
    %c0_33 = arith.constant 0 : index
    %c0_34 = arith.constant 0 : index
    %45 = vector.load %arg11[%c0_33, %c0_34] : memref<256x512xbf16, #tpu.memory_space<vmem>>, vector<256x512xbf16>
    %cst_35 = arith.constant dense<0.000000e+00> : vector<2x512xf32>
    %46 = tpu.matmul %44, %45, %cst_35 {dimension_numbers = #tpu.dot_dimension_numbers<[1], [0], [0], [1], [0, 0, 1, 1], [], []>} : vector<2x256xbf16>, vector<256x512xbf16>, vector<2x512xf32> -> vector<2x512xf32>
    %c0_36 = arith.constant 0 : index
    %c0_37 = arith.constant 0 : index
    %47 = vector.load %arg12[%c0_36, %c0_37] : memref<256x512xbf16, #tpu.memory_space<vmem>>, vector<256x512xbf16>
    %cst_38 = arith.constant dense<0.000000e+00> : vector<2x512xf32>
    %48 = tpu.matmul %23, %47, %cst_38 {dimension_numbers = #tpu.dot_dimension_numbers<[1], [0], [0], [1], [0, 0, 1, 1], [], []>} : vector<2x256xbf16>, vector<256x512xbf16>, vector<2x512xf32> -> vector<2x512xf32>
    %49 = arith.addf %46, %48 : vector<2x512xf32>
    %c0_39 = arith.constant 0 : index
    %c0_40 = arith.constant 0 : index
    %50 = vector.load %arg13[%c0_39, %c0_40] : memref<1x512xf32, #tpu.memory_space<vmem>>, vector<1x512xf32>
    %51 = vector.broadcast %50 : vector<1x512xf32> to vector<2x512xf32>
    %52 = arith.addf %49, %51 : vector<2x512xf32>
    %cst_41 = arith.constant 0.000000e+00 : f32
    %53 = vector.broadcast %cst_41 : f32 to vector<2x512xf32>
    %54 = arith.cmpf oge, %52, %53 : vector<2x512xf32>
    %cst_42 = arith.constant 2.000000e-01 : f32
    %55 = vector.broadcast %cst_42 : f32 to vector<2x512xf32>
    %56 = arith.mulf %55, %52 : vector<2x512xf32>
    %57 = arith.select %54, %52, %56 : vector<2x512xi1>, vector<2x512xf32>
    %58 = arith.truncf %57 : vector<2x512xf32> to vector<2x512xbf16>
    %c0_43 = arith.constant 0 : index
    %c0_44 = arith.constant 0 : index
    %59 = vector.load %arg14[%c0_43, %c0_44] : memref<512x256xbf16, #tpu.memory_space<vmem>>, vector<512x256xbf16>
    %cst_45 = arith.constant dense<0.000000e+00> : vector<2x256xf32>
    %60 = tpu.matmul %58, %59, %cst_45 {dimension_numbers = #tpu.dot_dimension_numbers<[1], [0], [0], [1], [0, 0, 1, 1], [], []>} : vector<2x512xbf16>, vector<512x256xbf16>, vector<2x256xf32> -> vector<2x256xf32>
    %c0_46 = arith.constant 0 : index
    %c0_47 = arith.constant 0 : index
    %61 = vector.load %arg15[%c0_46, %c0_47] : memref<1x256xf32, #tpu.memory_space<vmem>>, vector<1x256xf32>
    %62 = vector.broadcast %61 : vector<1x256xf32> to vector<2x256xf32>
    %63 = arith.addf %60, %62 : vector<2x256xf32>
    %64 = math.tanh %63 : vector<2x256xf32>
    %c0_48 = arith.constant 0 : index
    %c0_49 = arith.constant 0 : index
    %65 = vector.load %arg16[%c0_48, %c0_49] : memref<2x256xf32, #tpu.memory_space<vmem>>, vector<2x256xf32>
    tpu.vector_store %arg16[%c0_48, %c0_49], %64 {strides = array<i32>} : memref<2x256xf32, #tpu.memory_space<vmem>>, vector<2x256xf32>,
    return
  }
}

</mosaic_0001>

<bundles_post_ra>
// kernel: divco_plgan_forward.1
= control target key start
LH: loop header
LB: loop body
LE: loop exit
PB: predicated region body
PF: predicated region fallthrough
CT: control target
= control target key end

     0   :  { %s5498_s0 = inlined_call_operand.vmem [shape: bf16[2,256], index: 0, kind: input, shape index: {}]   ;;  %s5499_s1 = inlined_call_operand.vmem [shape: bf16[2,128], index: 1, kind: input, shape index: {}]   ;;  %s5500_s2 = inlined_call_operand.hbm [shape: bf16[256,512], index: 2, kind: input, shape index: {}]   ;;  %s5501_s3 = inlined_call_operand.vmem [shape: f32[1,512], index: 3, kind: input, shape index: {}]   ;;  %s5502_s4 = inlined_call_operand.hbm [shape: bf16[512,256], index: 4, kind: input, shape index: {}]   ;;  %s5503_s5 = inlined_call_operand.vmem [shape: f32[1,256], index: 5, kind: input, shape index: {}]   ;;  %s5504_s6 = inlined_call_operand.hbm [shape: bf16[256,128], index: 6, kind: input, shape index: {}]   ;;  %s5505_s7 = inlined_call_operand.vmem [shape: f32[1,128], index: 7, kind: input, shape index: {}]   ;;  %s5506_s8 = inlined_call_operand.hbm [shape: bf16[128,256], index: 8, kind: input, shape index: {}]   ;;  %s5507_s9 = inlined_call_operand.hbm [shape: bf16[128,256], index: 9, kind: input, shape index: {}]   ;;  %s5508_s10 = inlined_call_operand.vmem [shape: f32[1,256], index: 10, kind: input, shape index: {}]   ;;  %s5509_s11 = inlined_call_operand.hbm [shape: bf16[256,512], index: 11, kind: input, shape index: {}]   ;;  %s5510_s12 = inlined_call_operand.hbm [shape: bf16[256,512], index: 12, kind: input, shape index: {}]   ;;  %s5511_s13 = inlined_call_operand.vmem [shape: f32[1,512], index: 13, kind: input, shape index: {}]   ;;  %s5512_s14 = inlined_call_operand.hbm [shape: bf16[512,256], index: 14, kind: input, shape index: {}]   ;;  %s5513_s15 = inlined_call_operand.vmem [shape: f32[1,256], index: 15, kind: input, shape index: {}]   ;;  %s5514_s16 = inlined_call_operand.vmem [shape: f32[2,256], index: 16, kind: output, shape index: {0}]   ;;  %s5515_s17 = inlined_call_operand.hbm [shape: f32[2,128], index: 17, kind: output, shape index: {1}]  }
   0x1   :  { %5516 = sst [smem:[#allocation23_spill]] %s5498_s0 }
   0x2   :  { %5517 = sst [smem:[#allocation24_spill]] %s5499_s1 }
   0x3   :  { %23 = vsyncpa [#allocation3], 0 }
   0x4   :  { %24 = vsyncpa [#allocation6], 0 }
   0x5   :  { %25 = vsyncpa [#allocation9], 0 }
   0x6   :  { %26 = vsyncpa [#allocation12], 0 }
   0x7   :  { %27 = vsyncpa [#allocation15], 0  ;;  %s52_s26 = sshll.u32 %s5502_s4, 4  ;;  %s53_s26 = int_to_ptr.hbm [resolvable:$true] %s52_s26 }
   0x8   :  { %28 = vsyncpa [#allocation4], 0  ;;  %s5247_s27 = smov [#allocation5]   ;;  %s82_s30 = sshll.u32 %s5506_s8, 4  ;;  %s83_s30 = int_to_ptr.hbm [resolvable:$true] %s82_s30 }
   0x9   :  { %s54_s28 = sshll.u32 %s5247_s27, 4  ;;  %s5248_s18 = smov 128   ;;  %s55_s28 = int_to_ptr.vmem [resolvable:$true] %s54_s28 }
   0xa   :  { %s5249_s19 = smov 8   ;;  %s5250_s1 = smov [#allocation8]  }
   0xb   :  { %60 = dma.hbm_to_vmem [thread:$0]  %s53_s26, 8192, %s55_s28, [#allocation6], %s5248_s18, %s5248_s18, %s5249_s19  }
   0xc   :  { %s84_s20 = sshll.u32 %s5250_s1, 4  ;;  %s110_s22 = sshll.u32 %s5509_s11, 4  ;;  %s85_s20 = int_to_ptr.vmem [resolvable:$true] %s84_s20  ;;  %s111_s22 = int_to_ptr.hbm [resolvable:$true] %s110_s22 }
   0xd   :  { %90 = dma.hbm_to_vmem [thread:$0]  %s83_s30, 2048, %s85_s20, [#allocation9], %s5248_s18, %s5248_s18, %s5249_s19  }
   0xe   :  { %s5251_s8 = smov [#allocation11]   ;;  %s37_s26 = sshll.u32 %s5500_s2, 4  ;;  %s38_s26 = int_to_ptr.hbm [resolvable:$true] %s37_s26 }
   0xf   :  { %s112_s23 = sshll.u32 %s5251_s8, 4  ;;  %s5252_s27 = smov 256   ;;  %s113_s23 = int_to_ptr.vmem [resolvable:$true] %s112_s23 }
  0x10   :  { %s5253_s28 = smov 16   ;;  %s5254_s29 = smov [#allocation2]  }
  0x11   :  { %118 = dma.hbm_to_vmem [thread:$0]  %s111_s22, 8192, %s113_s23, [#allocation12], %s5252_s27, %s5252_s27, %s5253_s28  }
  0x12   :  { %s39_s0 = sshll.u32 %s5254_s29, 4  ;;  %s67_s11 = sshll.u32 %s5504_s6, 4  ;;  %s40_s0 = int_to_ptr.vmem [resolvable:$true] %s39_s0  ;;  %s68_s11 = int_to_ptr.hbm [resolvable:$true] %s67_s11 }
  0x13   :  { %45 = dma.hbm_to_vmem [thread:$0]  %s38_s26, 8192, %s40_s0, [#allocation3], %s5252_s27, %s5252_s27, %s5253_s28  }
  0x14   :  { %s5255_s2 = smov [#allocation7]   ;;  %s95_s22 = sshll.u32 %s5507_s9, 4  ;;  %s96_s22 = int_to_ptr.hbm [resolvable:$true] %s95_s22 }
  0x15   :  { %s69_s20 = sshll.u32 %s5255_s2, 4  ;;  %s5256_s8 = smov 64   ;;  %s70_s20 = int_to_ptr.vmem [resolvable:$true] %s69_s20 }
  0x16   :  { %s5257_s23 = smov 4   ;;  %s5258_s24 = smov [#allocation10]  }
  0x17   :  { %75 = dma.hbm_to_vmem [thread:$0]  %s68_s11, 2048, %s70_s20, [#allocation6], %s5256_s8, %s5256_s8, %s5257_s23  }
  0x18   :  { %s97_s25 = sshll.u32 %s5258_s24, 4  ;;  %s123_s30 = sshll.u32 %s5510_s12, 4  ;;  %s98_s25 = int_to_ptr.vmem [resolvable:$true] %s97_s25  ;;  %s124_s30 = int_to_ptr.hbm [resolvable:$true] %s123_s30 }
  0x19   :  { %103 = dma.hbm_to_vmem [thread:$0]  %s96_s22, 2048, %s98_s25, [#allocation9], %s5248_s18, %s5248_s18, %s5249_s19  }
  0x1a   :  { %s138_s9 = sshll.u32 %s5512_s14, 4  ;;  %s5259_s1 = smov [#allocation13]   ;;  %s139_s9 = int_to_ptr.hbm [resolvable:$true] %s138_s9 }
  0x1b   :  { %s125_s2 = sshll.u32 %s5259_s1, 4  ;;  %s5260_s11 = smov [#allocation14]   ;;  %s126_s2 = int_to_ptr.vmem [resolvable:$true] %s125_s2 }
  0x1c   :  { %131 = dma.hbm_to_vmem [thread:$0]  %s124_s30, 8192, %s126_s2, [#allocation12], %s5252_s27, %s5252_s27, %s5253_s28  }
  0x1d   :  { %s140_s12 = sshll.u32 %s5260_s11, 4  ;;  %s141_s12 = int_to_ptr.vmem [resolvable:$true] %s140_s12 }
  0x1e   :  { %146 = dma.hbm_to_vmem [thread:$0]  %s139_s9, 8192, %s141_s12, [#allocation15], %s5248_s18, %s5248_s18, %s5249_s19  }
  0x1f   :  { %5235 = dma.done.wait [#allocation3], 8192  }
  0x20   :  { %5236 = vsyncadd [#allocation3], 4294959104 }
  0x21   :  { %5237 = dma.done.wait [#allocation6], 10240  }
  0x22   :  { %5238 = vsyncadd [#allocation6], 4294957056 }
  0x23   :  { %5239 = dma.done.wait [#allocation9], 4096  }
  0x24   :  { %5240 = vsyncadd [#allocation9], 4294963200 }
  0x25   :  { %5241 = dma.done.wait [#allocation12], 16384  }
  0x26   :  { %5242 = vsyncadd [#allocation12], 4294950912 }
  0x27   :  { %5243 = dma.done.wait [#allocation15], 8192  }
  0x28   :  { %5244 = vsyncadd [#allocation15], 4294959104  ;;  %v3273_v0 = vld [vmem:[#allocation2 + $0xe0] sm:$0xf]  ;;  %v4661_v1 = vld [vmem:[#allocation2 + $0xec] sm:$0xf0] }
  0x29   :  { %v3401_v2 = vld [vmem:[#allocation2 + $0x1e0] sm:$0xf]  ;;  %v3274_v3 = vor.u32 %v4661_v1, %v3273_v0  ;;  %v4693_v4 = vld [vmem:[#allocation2 + $0x1ec] sm:$0xf0]  ;;  %v4659_v5 = vld [vmem:[#allocation2 + $0xe4] sm:$0xf] }
  0x2a   :  { %v3275_v6 = vld [vmem:[#allocation2 + $0xf0] sm:$0xf0]  ;;  %v3402_v7 = vor.u32 %v4693_v4, %v3401_v2  ;;  %v4691_v9 = vld [vmem:[#allocation2 + $0x1e4] sm:$0xf]  ;;  %v3257_v11 = vld [vmem:[#allocation2 + $0xc0] sm:$0xf] }
  0x2b   :  { %v3278_v8 = vor.u32 %v4659_v5, %v3275_v6  ;;  %v3403_v10 = vld [vmem:[#allocation2 + $0x1f0] sm:$0xf0]  ;;  %583 = vmatpush.bf16.msra.mxu0 %v3274_v3  ;;  %v4657_v13 = vld [vmem:[#allocation2 + $0xcc] sm:$0xf0]  ;;  %v3385_v14 = vld [vmem:[#allocation2 + $0x1c0] sm:$0xf] }
  0x2c   :  { %v3406_v12 = vor.u32 %v4691_v9, %v3403_v10  ;;  %v4689_v15 = vld [vmem:[#allocation2 + $0x1cc] sm:$0xf0]  ;;  %596 = vmatpush.bf16.msra.mxu1 %v3402_v7  ;;  %v3258_v16 = vor.u32 %v4657_v13, %v3257_v11  ;;  %v4655_v18 = vld [vmem:[#allocation2 + $0xc4] sm:$0xf]  ;;  %v3259_v19 = vld [vmem:[#allocation2 + $0xd0] sm:$0xf0] }
  0x2d   :  { %609 = vmatpush.bf16.msra.mxu2 %v3278_v8  ;;  %v3386_v17 = vor.u32 %v4689_v15, %v3385_v14  ;;  %v4687_v20 = vld [vmem:[#allocation2 + $0x1c4] sm:$0xf]  ;;  %v3262_v21 = vor.u32 %v4655_v18, %v3259_v19  ;;  %v3387_v22 = vld [vmem:[#allocation2 + $0x1d0] sm:$0xf0]  ;;  %v3241_v23 = vld [vmem:[#allocation2 + $0xa0] sm:$0xf] }
  0x2e   :  { %622 = vmatpush.bf16.msra.mxu3 %v3406_v12  ;;  %v4653_v24 = vld [vmem:[#allocation2 + $0xac] sm:$0xf0]  ;;  %v3390_v25 = vor.u32 %v4687_v20, %v3387_v22  ;;  %v3369_v26 = vld [vmem:[#allocation2 + $0x1a0] sm:$0xf]  ;;  %v4651_v28 = vld [vmem:[#allocation2 + $0xa4] sm:$0xf] }
  0x2f   :  { %v4685_v27 = vld [vmem:[#allocation2 + $0x1ac] sm:$0xf0]  ;;  %584 = vmatpush.bf16.msra.mxu0 %v3258_v16  ;;  %v3242_v29 = vor.u32 %v4653_v24, %v3241_v23  ;;  %v3243_v30 = vld [vmem:[#allocation2 + $0xb0] sm:$0xf0]  ;;  %v4683_v31 = vld [vmem:[#allocation2 + $0x1a4] sm:$0xf] }
  0x30   :  { %v3371_v32 = vld [vmem:[#allocation2 + $0x1b0] sm:$0xf0]  ;;  %597 = vmatpush.bf16.msra.mxu1 %v3386_v17  ;;  %v3370_v33 = vor.u32 %v4685_v27, %v3369_v26  ;;  %v3246_v34 = vor.u32 %v4651_v28, %v3243_v30  ;;  %v3225_v35 = vld [vmem:[#allocation2 + $0x80] sm:$0xf]  ;;  %v4649_v36 = vld [vmem:[#allocation2 + $0x8c] sm:$0xf0] }
  0x31   :  { %610 = vmatpush.bf16.msra.mxu2 %v3262_v21  ;;  %v3353_v37 = vld [vmem:[#allocation2 + $0x180] sm:$0xf]  ;;  %v3374_v38 = vor.u32 %v4683_v31, %v3371_v32  ;;  %v4681_v39 = vld [vmem:[#allocation2 + $0x18c] sm:$0xf0]  ;;  %v4647_v40 = vld [vmem:[#allocation2 + $0x84] sm:$0xf]  ;;  %v3226_v44 = vor.u32 %v4649_v36, %v3225_v35 }
  0x32   :  { %623 = vmatpush.bf16.msra.mxu3 %v3390_v25  ;;  %v3227_v41 = vld [vmem:[#allocation2 + $0x90] sm:$0xf0]  ;;  %v4679_v42 = vld [vmem:[#allocation2 + $0x184] sm:$0xf]  ;;  %v3354_v45 = vor.u32 %v4681_v39, %v3353_v37  ;;  %v3209_v47 = vld [vmem:[#allocation2 + $0x60] sm:$0xf] }
  0x33   :  { %v3355_v43 = vld [vmem:[#allocation2 + $0x190] sm:$0xf0]  ;;  %585 = vmatpush.bf16.msra.mxu0 %v3242_v29  ;;  %v3230_v46 = vor.u32 %v4647_v40, %v3227_v41  ;;  %v4645_v48 = vld [vmem:[#allocation2 + $0x6c] sm:$0xf0]  ;;  %v3337_v49 = vld [vmem:[#allocation2 + $0x160] sm:$0xf] }
  0x34   :  { %598 = vmatpush.bf16.msra.mxu1 %v3370_v33  ;;  %v3358_v50 = vor.u32 %v4679_v42, %v3355_v43  ;;  %v4677_v51 = vld [vmem:[#allocation2 + $0x16c] sm:$0xf0]  ;;  %v4643_v52 = vld [vmem:[#allocation2 + $0x64] sm:$0xf]  ;;  %v3211_v53 = vld [vmem:[#allocation2 + $0x70] sm:$0xf0]  ;;  %v3210_v56 = vor.u32 %v4645_v48, %v3209_v47 }
  0x35   :  { %611 = vmatpush.bf16.msra.mxu2 %v3246_v34  ;;  %v4675_v54 = vld [vmem:[#allocation2 + $0x164] sm:$0xf]  ;;  %v3339_v55 = vld [vmem:[#allocation2 + $0x170] sm:$0xf0]  ;;  %v3338_v57 = vor.u32 %v4677_v51, %v3337_v49  ;;  %v3214_v58 = vor.u32 %v4643_v52, %v3211_v53  ;;  %v3193_v59 = vld [vmem:[#allocation2 + $0x40] sm:$0xf] }
  0x36   :  { %624 = vmatpush.bf16.msra.mxu3 %v3374_v38  ;;  %v4641_v60 = vld [vmem:[#allocation2 + $0x4c] sm:$0xf0]  ;;  %v3321_v61 = vld [vmem:[#allocation2 + $0x140] sm:$0xf]  ;;  %v3342_v62 = vor.u32 %v4675_v54, %v3339_v55  ;;  %v4639_v0 = vld [vmem:[#allocation2 + $0x44] sm:$0xf] }
  0x37   :  { %586 = vmatpush.bf16.msra.mxu0 %v3226_v44  ;;  %v4673_v63 = vld [vmem:[#allocation2 + $0x14c] sm:$0xf0]  ;;  %v3195_v1 = vld [vmem:[#allocation2 + $0x50] sm:$0xf0]  ;;  %v4671_v2 = vld [vmem:[#allocation2 + $0x144] sm:$0xf]  ;;  %v3194_v4 = vor.u32 %v4641_v60, %v3193_v59 }
  0x38   :  { %599 = vmatpush.bf16.msra.mxu1 %v3354_v45  ;;  %v3323_v3 = vld [vmem:[#allocation2 + $0x150] sm:$0xf0]  ;;  %v3322_v5 = vor.u32 %v4673_v63, %v3321_v61  ;;  %v3198_v6 = vor.u32 %v4639_v0, %v3195_v1  ;;  %v3177_v7 = vld [vmem:[#allocation2 + $0x20] sm:$0xf]  ;;  %v4637_v8 = vld [vmem:[#allocation2 + $0x2c] sm:$0xf0] }
  0x39   :  { %612 = vmatpush.bf16.msra.mxu2 %v3230_v46  ;;  %v3305_v9 = vld [vmem:[#allocation2 + $0x120] sm:$0xf]  ;;  %v3326_v10 = vor.u32 %v4671_v2, %v3323_v3  ;;  %v4669_v11 = vld [vmem:[#allocation2 + $0x12c] sm:$0xf0]  ;;  %v4635_v12 = vld [vmem:[#allocation2 + $0x24] sm:$0xf]  ;;  %v3178_v17 = vor.u32 %v4637_v8, %v3177_v7 }
  0x3a   :  { %625 = vmatpush.bf16.msra.mxu3 %v3358_v50  ;;  %v3179_v13 = vld [vmem:[#allocation2 + $0x30] sm:$0xf0]  ;;  %v4667_v14 = vld [vmem:[#allocation2 + $0x124] sm:$0xf]  ;;  %v3161_v16 = vld [vmem:[#allocation2] sm:$0xf]  ;;  %v3306_v21 = vor.u32 %v4669_v11, %v3305_v9 }
  0x3b   :  { %587 = vmatpush.bf16.msra.mxu0 %v3210_v56  ;;  %v3307_v15 = vld [vmem:[#allocation2 + $0x130] sm:$0xf0]  ;;  %v4633_v18 = vld [vmem:[#allocation2 + $0xc] sm:$0xf0]  ;;  %v3289_v19 = vld [vmem:[#allocation2 + $0x100] sm:$0xf]  ;;  %v3182_v22 = vor.u32 %v4635_v12, %v3179_v13 }
  0x3c   :  { %600 = vmatpush.bf16.msra.mxu1 %v3338_v57  ;;  %v4665_v20 = vld [vmem:[#allocation2 + $0x10c] sm:$0xf0]  ;;  %v4631_v23 = vld [vmem:[#allocation2 + $0x4] sm:$0xf]  ;;  %v3163_v24 = vld [vmem:[#allocation2 + $0x10] sm:$0xf0]  ;;  %v3310_v26 = vor.u32 %v4667_v14, %v3307_v15  ;;  %v3162_v32 = vor.u32 %v4633_v18, %v3161_v16 }
  0x3d   :  { %613 = vmatpush.bf16.msra.mxu2 %v3214_v58  ;;  %s5518_s19 = sld [smem:[#allocation23_spill]]  ;;  %v4663_v27 = vld [vmem:[#allocation2 + $0x104] sm:$0xf]  ;;  %v3291_v28 = vld [vmem:[#allocation2 + $0x110] sm:$0xf0]  ;;  %v3290_v36 = vor.u32 %v4665_v20, %v3289_v19  ;;  %v3166_v37 = vor.u32 %v4631_v23, %v3163_v24  ;;  %s3143_s30 = sshll.u32 %s5515_s17, 4  ;;  %s3144_s30 = int_to_ptr.hbm [resolvable:$true] %s3143_s30 }
  0x3e   :  { %626 = vmatpush.bf16.msra.mxu3 %v3342_v62  ;;  %v3281_v29 = vld [vmem:[#allocation2 + $0xe8] sm:$0xf]  ;;  %v4662_v30 = vld [vmem:[#allocation2 + $0xf4] sm:$0xf0]  ;;  %v4660_v34 = vld [vmem:[#allocation2 + $0xec] sm:$0xf]  ;;  %v3294_v40 = vor.u32 %v4663_v27, %v3291_v28 }
  0x3f   :  { %588 = vmatpush.bf16.msra.mxu0 %v3194_v4  ;;  %v3409_v31 = vld [vmem:[#allocation2 + $0x1e8] sm:$0xf]  ;;  %v4694_v33 = vld [vmem:[#allocation2 + $0x1f4] sm:$0xf0]  ;;  %v3283_v35 = vld [vmem:[#allocation2 + $0xf8] sm:$0xf0]  ;;  %v3282_v41 = vor.u32 %v4662_v30, %v3281_v29 }
  0x40   :  { %601 = vmatpush.bf16.msra.mxu1 %v3322_v5  ;;  %v4692_v38 = vld [vmem:[#allocation2 + $0x1ec] sm:$0xf]  ;;  %v3411_v39 = vld [vmem:[#allocation2 + $0x1f8] sm:$0xf0]  ;;  %v3410_v42 = vor.u32 %v4694_v33, %v3409_v31  ;;  %v3286_v43 = vor.u32 %v4660_v34, %v3283_v35  ;;  %v3265_v44 = vld [vmem:[#allocation2 + $0xc8] sm:$0xf] }
  0x41   :  { %614 = vmatpush.bf16.msra.mxu2 %v3198_v6  ;;  %v4658_v45 = vld [vmem:[#allocation2 + $0xd4] sm:$0xf0]  ;;  %v3393_v46 = vld [vmem:[#allocation2 + $0x1c8] sm:$0xf]  ;;  %v3414_v47 = vor.u32 %v4692_v38, %v3411_v39  ;;  %v4656_v49 = vld [vmem:[#allocation2 + $0xcc] sm:$0xf] }
  0x42   :  { %627 = vmatpush.bf16.msra.mxu3 %v3326_v10  ;;  %v4690_v48 = vld [vmem:[#allocation2 + $0x1d4] sm:$0xf0]  ;;  %v3267_v50 = vld [vmem:[#allocation2 + $0xd8] sm:$0xf0]  ;;  %v4688_v52 = vld [vmem:[#allocation2 + $0x1cc] sm:$0xf]  ;;  %v3266_v55 = vor.u32 %v4658_v45, %v3265_v44 }
  0x43   :  { %v181_v25 = vld [vmem:[%s5518_s19] sm:$0x3]  ;;  %589 = vmatpush.bf16.msra.mxu0 %v3178_v17  ;;  %v3395_v53 = vld [vmem:[#allocation2 + $0x1d8] sm:$0xf0]  ;;  %v3394_v56 = vor.u32 %v4690_v48, %v3393_v46  ;;  %v3270_v57 = vor.u32 %v4656_v49, %v3267_v50  ;;  %v3249_v58 = vld [vmem:[#allocation2 + $0xa8] sm:$0xf] }
  0x44   :  { %258 = vst [vmem:[#allocation1] ss:$9 sm:$0xff] %v181_v25  ;;  %602 = vmatpush.bf16.msra.mxu1 %v3306_v21  ;;  %v4654_v59 = vld [vmem:[#allocation2 + $0xb4] sm:$0xf0]  ;;  %v3377_v60 = vld [vmem:[#allocation2 + $0x1a8] sm:$0xf]  ;;  %v3398_v61 = vor.u32 %v4688_v52, %v3395_v53 }
  0x45   :  { %615 = vmatpush.bf16.msra.mxu2 %v3182_v22  ;;  %v4686_v62 = vld [vmem:[#allocation2 + $0x1b4] sm:$0xf0]  ;;  %v4652_v63 = vld [vmem:[#allocation2 + $0xac] sm:$0xf]  ;;  %v3251_v0 = vld [vmem:[#allocation2 + $0xb8] sm:$0xf0]  ;;  %v3250_v3 = vor.u32 %v4654_v59, %v3249_v58 }
  0x46   :  { %628 = vmatpush.bf16.msra.mxu3 %v3310_v26  ;;  %v4684_v1 = vld [vmem:[#allocation2 + $0x1ac] sm:$0xf]  ;;  %v3379_v2 = vld [vmem:[#allocation2 + $0x1b8] sm:$0xf0]  ;;  %v3378_v4 = vor.u32 %v4686_v62, %v3377_v60  ;;  %v3254_v5 = vor.u32 %v4652_v63, %v3251_v0  ;;  %v3233_v6 = vld [vmem:[#allocation2 + $0x88] sm:$0xf] }
  0x47   :  { %590 = vmatpush.bf16.msra.mxu0 %v3162_v32  ;;  %v4650_v7 = vld [vmem:[#allocation2 + $0x94] sm:$0xf0]  ;;  %v3361_v8 = vld [vmem:[#allocation2 + $0x188] sm:$0xf]  ;;  %v3382_v9 = vor.u32 %v4684_v1, %v3379_v2  ;;  %v4648_v11 = vld [vmem:[#allocation2 + $0x8c] sm:$0xf] }
  0x48   :  { %603 = vmatpush.bf16.msra.mxu1 %v3290_v36  ;;  %v4682_v10 = vld [vmem:[#allocation2 + $0x194] sm:$0xf0]  ;;  %v3235_v12 = vld [vmem:[#allocation2 + $0x98] sm:$0xf0]  ;;  %v4680_v13 = vld [vmem:[#allocation2 + $0x18c] sm:$0xf]  ;;  %v3234_v15 = vor.u32 %v4650_v7, %v3233_v6 }
  0x49   :  { %616 = vmatpush.bf16.msra.mxu2 %v3166_v37  ;;  %v3363_v14 = vld [vmem:[#allocation2 + $0x198] sm:$0xf0]  ;;  %v3362_v16 = vor.u32 %v4682_v10, %v3361_v8  ;;  %v3238_v17 = vor.u32 %v4648_v11, %v3235_v12  ;;  %v3217_v18 = vld [vmem:[#allocation2 + $0x68] sm:$0xf]  ;;  %v4646_v19 = vld [vmem:[#allocation2 + $0x74] sm:$0xf0] }
  0x4a   :  { %629 = vmatpush.bf16.msra.mxu3 %v3294_v40  ;;  %v3345_v20 = vld [vmem:[#allocation2 + $0x168] sm:$0xf]  ;;  %v3366_v21 = vor.u32 %v4680_v13, %v3363_v14  ;;  %v4678_v22 = vld [vmem:[#allocation2 + $0x174] sm:$0xf0]  ;;  %v4644_v23 = vld [vmem:[#allocation2 + $0x6c] sm:$0xf]  ;;  %v3218_v27 = vor.u32 %v4646_v19, %v3217_v18 }
  0x4b   :  { %v5400_v51 = vld [vmem:[#allocation1] sm:$0xff]  ;;  %635 = vmatpush.bf16.msrb.mxu0 %v3282_v41  ;;  %v5402_v54 = vld [vmem:[#allocation1 + $0x9] sm:$0xff]  ;;  %v4676_v25 = vld [vmem:[#allocation2 + $0x16c] sm:$0xf]  ;;  %v3346_v28 = vor.u32 %v4678_v22, %v3345_v20  ;;  %s5519_s21 = sld [smem:[#allocation24_spill]]  ;;  %vm3130_vm12 = vcmask 1041408  }
  0x4c   :  { %648 = vmatpush.bf16.msrb.mxu1 %v3410_v42  ;;  %591 = vmatmul.bf16.vlgmr.msra.gmra.mxu0 %v5400_v51  ;;  %v3219_v24 = vld [vmem:[#allocation2 + $0x78] sm:$0xf0]  ;;  %v3201_v30 = vld [vmem:[#allocation2 + $0x48] sm:$0xf]  ;;  %v4642_v31 = vld [vmem:[#allocation2 + $0x54] sm:$0xf0] }
  0x4d   :  { %661 = vmatpush.bf16.msrb.mxu2 %v3286_v43  ;;  %604 = vmatmul.bf16.vlgmr.msra.gmra.mxu1 %v5402_v54  ;;  %v3347_v26 = vld [vmem:[#allocation2 + $0x178] sm:$0xf0]  ;;  %v3222_v29 = vor.u32 %v4644_v23, %v3219_v24  ;;  %v3329_v32 = vld [vmem:[#allocation2 + $0x148] sm:$0xf]  ;;  %v4674_v34 = vld [vmem:[#allocation2 + $0x154] sm:$0xf0]  ;;  %v3202_v39 = vor.u32 %v4642_v31, %v3201_v30 }
  0x4e   :  { %674 = vmatpush.bf16.msrb.mxu3 %v3414_v47  ;;  %617 = vmatmul.bf16.vlgmr.msra.gmra.mxu2 %v5400_v51  ;;  %v3350_v33 = vor.u32 %v4676_v25, %v3347_v26  ;;  %v4640_v35 = vld [vmem:[#allocation2 + $0x4c] sm:$0xf]  ;;  %v3203_v36 = vld [vmem:[#allocation2 + $0x58] sm:$0xf0]  ;;  %v3185_v40 = vld [vmem:[#allocation2 + $0x28] sm:$0xf]  ;;  %v3330_v41 = vor.u32 %v4674_v34, %v3329_v32 }
  0x4f   :  { %630 = vmatmul.bf16.vlgmr.msra.gmra.mxu3 %v5402_v54  ;;  %636 = vmatpush.bf16.msrb.mxu0 %v3266_v55  ;;  %v4672_v37 = vld [vmem:[#allocation2 + $0x14c] sm:$0xf]  ;;  %v3331_v38 = vld [vmem:[#allocation2 + $0x158] sm:$0xf0]  ;;  %v3206_v42 = vor.u32 %v4640_v35, %v3203_v36  ;;  %v4638_v43 = vld [vmem:[#allocation2 + $0x34] sm:$0xf0] }
  0x50   :  { %649 = vmatpush.bf16.msrb.mxu1 %v3394_v56  ;;  %v3313_v44 = vld [vmem:[#allocation2 + $0x128] sm:$0xf]  ;;  %v3334_v45 = vor.u32 %v4672_v37, %v3331_v38  ;;  %v4670_v46 = vld [vmem:[#allocation2 + $0x134] sm:$0xf0]  ;;  %v4636_v47 = vld [vmem:[#allocation2 + $0x2c] sm:$0xf]  ;;  %v3186_v52 = vor.u32 %v4638_v43, %v3185_v40 }
  0x51   :  { %662 = vmatpush.bf16.msrb.mxu2 %v3270_v57  ;;  %v3187_v48 = vld [vmem:[#allocation2 + $0x38] sm:$0xf0]  ;;  %v4668_v49 = vld [vmem:[#allocation2 + $0x12c] sm:$0xf]  ;;  %v3169_v53 = vld [vmem:[#allocation2 + $0x8] sm:$0xf]  ;;  %v3314_v55 = vor.u32 %v4670_v46, %v3313_v44 }
  0x52   :  { %675 = vmatpush.bf16.msrb.mxu3 %v3398_v61  ;;  %v3315_v50 = vld [vmem:[#allocation2 + $0x138] sm:$0xf0]  ;;  %v3190_v56 = vor.u32 %v4636_v47, %v3187_v48  ;;  %v4634_v57 = vld [vmem:[#allocation2 + $0x14] sm:$0xf0]  ;;  %v3297_v58 = vld [vmem:[#allocation2 + $0x108] sm:$0xf] }
  0x53   :  { %637 = vmatpush.bf16.msrb.mxu0 %v3250_v3  ;;  %v4666_v59 = vld [vmem:[#allocation2 + $0x114] sm:$0xf0]  ;;  %v3318_v60 = vor.u32 %v4668_v49, %v3315_v50  ;;  %v4632_v61 = vld [vmem:[#allocation2 + $0xc] sm:$0xf]  ;;  %v3171_v62 = vld [vmem:[#allocation2 + $0x18] sm:$0xf0]  ;;  %v3170_v3 = vor.u32 %v4634_v57, %v3169_v53 }
  0x54   :  { %650 = vmatpush.bf16.msrb.mxu1 %v3378_v4  ;;  %v4664_v63 = vld [vmem:[#allocation2 + $0x10c] sm:$0xf]  ;;  %v3299_v0 = vld [vmem:[#allocation2 + $0x118] sm:$0xf0]  ;;  %v3473_v1 = vld [vmem:[#allocation5 + $0x70] sm:$0xf]  ;;  %v3298_v6 = vor.u32 %v4666_v59, %v3297_v58  ;;  %v3174_v7 = vor.u32 %v4632_v61, %v3171_v62 }
  0x55   :  { %663 = vmatpush.bf16.msrb.mxu2 %v3254_v5  ;;  %v4710_v2 = vld [vmem:[#allocation5 + $0x74] sm:$0xf0]  ;;  %v3537_v4 = vld [vmem:[#allocation5 + $0xf0] sm:$0xf]  ;;  %v3302_v8 = vor.u32 %v4664_v63, %v3299_v0  ;;  %v3465_v12 = vld [vmem:[#allocation5 + $0x60] sm:$0xf] }
  0x56   :  { %676 = vmatpush.bf16.msrb.mxu3 %v3382_v9  ;;  %v4726_v5 = vld [vmem:[#allocation5 + $0xf4] sm:$0xf0]  ;;  %v3474_v9 = vor.u32 %v4710_v2, %v3473_v1  ;;  %v3601_v10 = vld [vmem:[#allocation5 + $0x170] sm:$0xf]  ;;  %v4708_v13 = vld [vmem:[#allocation5 + $0x64] sm:$0xf0] }
  0x57   :  { %638 = vmatpush.bf16.msrb.mxu0 %v3234_v15  ;;  %v4742_v11 = vld [vmem:[#allocation5 + $0x174] sm:$0xf0]  ;;  %v3538_v14 = vor.u32 %v4726_v5, %v3537_v4  ;;  %v3529_v15 = vld [vmem:[#allocation5 + $0xe0] sm:$0xf]  ;;  %v3466_v18 = vor.u32 %v4708_v13, %v3465_v12  ;;  %v4740_v20 = vld [vmem:[#allocation5 + $0x164] sm:$0xf0] }
  0x58   :  { %651 = vmatpush.bf16.msrb.mxu1 %v3362_v16  ;;  %v4724_v16 = vld [vmem:[#allocation5 + $0xe4] sm:$0xf0]  ;;  %v3593_v19 = vld [vmem:[#allocation5 + $0x160] sm:$0xf]  ;;  %v4706_v22 = vld [vmem:[#allocation5 + $0x54] sm:$0xf0] }
  0x59   :  { %664 = vmatpush.bf16.msrb.mxu2 %v3238_v17  ;;  %v3602_v17 = vor.u32 %v4742_v11, %v3601_v10  ;;  %v3530_v23 = vor.u32 %v4724_v16, %v3529_v15  ;;  %v3521_v24 = vld [vmem:[#allocation5 + $0xd0] sm:$0xf]  ;;  %v4722_v25 = vld [vmem:[#allocation5 + $0xd4] sm:$0xf0]  ;;  %v3594_v26 = vor.u32 %v4740_v20, %v3593_v19  ;;  %v3513_v31 = vld [vmem:[#allocation5 + $0xc0] sm:$0xf] }
  0x5a   :  { %677 = vmatpush.bf16.msrb.mxu3 %v3366_v21  ;;  %v3457_v21 = vld [vmem:[#allocation5 + $0x50] sm:$0xf]  ;;  %v3522_v30 = vor.u32 %v4722_v25, %v3521_v24  ;;  %v4720_v32 = vld [vmem:[#allocation5 + $0xc4] sm:$0xf0]  ;;  %v4718_v37 = vld [vmem:[#allocation5 + $0xb4] sm:$0xf0] }
  0x5b   :  { %639 = vmatpush.bf16.msrb.mxu0 %v3218_v27  ;;  %v3458_v27 = vor.u32 %v4706_v22, %v3457_v21  ;;  %v3441_v34 = vld [vmem:[#allocation5 + $0x30] sm:$0xf]  ;;  %v3514_v35 = vor.u32 %v4720_v32, %v3513_v31  ;;  %v3433_v38 = vld [vmem:[#allocation5 + $0x20] sm:$0xf]  ;;  %v4714_v48 = vld [vmem:[#allocation5 + $0x94] sm:$0xf0] }
  0x5c   :  { %652 = vmatpush.bf16.msrb.mxu1 %v3346_v28  ;;  %v3449_v28 = vld [vmem:[#allocation5 + $0x40] sm:$0xf]  ;;  %v3505_v36 = vld [vmem:[#allocation5 + $0xb0] sm:$0xf]  ;;  %v4707_v59 = vld [vmem:[#allocation5 + $0x64] sm:$0xf] }
  0x5d   :  { %665 = vmatpush.bf16.msrb.mxu2 %v3222_v29  ;;  %v4704_v29 = vld [vmem:[#allocation5 + $0x44] sm:$0xf0]  ;;  %v3506_v40 = vor.u32 %v4718_v37, %v3505_v36  ;;  %v3425_v44 = vld [vmem:[#allocation5 + $0x10] sm:$0xf]  ;;  %v3417_v50 = vld [vmem:[#allocation5] sm:$0xf] }
  0x5e   :  { %678 = vmatpush.bf16.msrb.mxu3 %v3350_v33  ;;  %v3450_v33 = vor.u32 %v4704_v29, %v3449_v28  ;;  %v3489_v47 = vld [vmem:[#allocation5 + $0x90] sm:$0xf]  ;;  %v3481_v62 = vld [vmem:[#allocation5 + $0x80] sm:$0xf]  ;;  %v4712_v63 = vld [vmem:[#allocation5 + $0x84] sm:$0xf0] }
  0x5f   :  { %640 = vmatpush.bf16.msrb.mxu0 %v3202_v39  ;;  %v4700_v39 = vld [vmem:[#allocation5 + $0x24] sm:$0xf0]  ;;  %v3490_v53 = vor.u32 %v4714_v48, %v3489_v47  ;;  %v3482_v0 = vor.u32 %v4712_v63, %v3481_v62  ;;  %v3665_v1 = vld [vmem:[#allocation5 + $0x1f0] sm:$0xf]  ;;  %v4758_v2 = vld [vmem:[#allocation5 + $0x1f4] sm:$0xf0] }
  0x60   :  { %653 = vmatpush.bf16.msrb.mxu1 %v3330_v41  ;;  %v3497_v41 = vld [vmem:[#allocation5 + $0xa0] sm:$0xf]  ;;  %v3434_v43 = vor.u32 %v4700_v39, %v3433_v38  ;;  %v3666_v4 = vor.u32 %v4758_v2, %v3665_v1  ;;  %v3539_v5 = vld [vmem:[#allocation5 + $0xf8] sm:$0xf0]  ;;  %v4723_v15 = vld [vmem:[#allocation5 + $0xe4] sm:$0xf] }
  0x61   :  { %666 = vmatpush.bf16.msrb.mxu2 %v3206_v42  ;;  %v4716_v42 = vld [vmem:[#allocation5 + $0xa4] sm:$0xf0]  ;;  %v3459_v11 = vld [vmem:[#allocation5 + $0x58] sm:$0xf0]  ;;  %v3657_v13 = vld [vmem:[#allocation5 + $0x1e0] sm:$0xf] }
  0x62   :  { %679 = vmatpush.bf16.msrb.mxu3 %v3334_v45  ;;  %v4698_v45 = vld [vmem:[#allocation5 + $0x14] sm:$0xf0]  ;;  %v3498_v46 = vor.u32 %v4716_v42, %v3497_v41  ;;  %v3577_v19 = vld [vmem:[#allocation5 + $0x140] sm:$0xf]  ;;  %v4736_v20 = vld [vmem:[#allocation5 + $0x144] sm:$0xf0] }
  0x63   :  { %641 = vmatpush.bf16.msrb.mxu0 %v3186_v52  ;;  %v3426_v49 = vor.u32 %v4698_v45, %v3425_v44  ;;  %v4696_v52 = vld [vmem:[#allocation5 + $0x4] sm:$0xf0]  ;;  %v4703_v21 = vld [vmem:[#allocation5 + $0x44] sm:$0xf]  ;;  %v3578_v22 = vor.u32 %v4736_v20, %v3577_v19  ;;  %v3649_v25 = vld [vmem:[#allocation5 + $0x1d0] sm:$0xf] }
  0x64   :  { %654 = vmatpush.bf16.msrb.mxu1 %v3314_v55  ;;  %v4709_v55 = vld [vmem:[#allocation5 + $0x74] sm:$0xf]  ;;  %v3418_v57 = vor.u32 %v4696_v52, %v3417_v50  ;;  %v3523_v29 = vld [vmem:[#allocation5 + $0xd8] sm:$0xf0]  ;;  %v3569_v31 = vld [vmem:[#allocation5 + $0x130] sm:$0xf] }
  0x65   :  { %667 = vmatpush.bf16.msrb.mxu2 %v3190_v56  ;;  %v3475_v56 = vld [vmem:[#allocation5 + $0x78] sm:$0xf0]  ;;  %v4734_v32 = vld [vmem:[#allocation5 + $0x134] sm:$0xf0]  ;;  %v3641_v36 = vld [vmem:[#allocation5 + $0x1c0] sm:$0xf] }
  0x66   :  { %680 = vmatpush.bf16.msrb.mxu3 %v3318_v60  ;;  %v3478_v58 = vor.u32 %v4709_v55, %v3475_v56  ;;  %v3467_v60 = vld [vmem:[#allocation5 + $0x68] sm:$0xf0]  ;;  %v4752_v37 = vld [vmem:[#allocation5 + $0x1c4] sm:$0xf0]  ;;  %v3561_v41 = vld [vmem:[#allocation5 + $0x120] sm:$0xf] }
  0x67   :  { %642 = vmatpush.bf16.msrb.mxu0 %v3170_v3  ;;  %v3470_v61 = vor.u32 %v4707_v59, %v3467_v60  ;;  %v4725_v3 = vld [vmem:[#allocation5 + $0xf4] sm:$0xf]  ;;  %v3642_v38 = vor.u32 %v4752_v37, %v3641_v36  ;;  %v3515_v39 = vld [vmem:[#allocation5 + $0xc8] sm:$0xf0]  ;;  %v4732_v42 = vld [vmem:[#allocation5 + $0x124] sm:$0xf0] }
  0x68   :  { %655 = vmatpush.bf16.msrb.mxu1 %v3298_v6  ;;  %v3542_v6 = vor.u32 %v4725_v3, %v3539_v5  ;;  %v3562_v44 = vor.u32 %v4732_v42, %v3561_v41  ;;  %v3435_v45 = vld [vmem:[#allocation5 + $0x28] sm:$0xf0]  ;;  %v3633_v47 = vld [vmem:[#allocation5 + $0x1b0] sm:$0xf]  ;;  %v4750_v48 = vld [vmem:[#allocation5 + $0x1b4] sm:$0xf0] }
  0x69   :  { %668 = vmatpush.bf16.msrb.mxu2 %v3174_v7  ;;  %v3585_v7 = vld [vmem:[#allocation5 + $0x150] sm:$0xf]  ;;  %v3634_v50 = vor.u32 %v4750_v48, %v3633_v47  ;;  %v3507_v52 = vld [vmem:[#allocation5 + $0xb8] sm:$0xf0]  ;;  %v4730_v55 = vld [vmem:[#allocation5 + $0x114] sm:$0xf0] }
  0x6a   :  { %681 = vmatpush.bf16.msrb.mxu3 %v3302_v8  ;;  %643 = vmatmul.bf16.vlgmr.msrb.gmra.mxu0 %v5400_v51  ;;  %v4738_v8 = vld [vmem:[#allocation5 + $0x154] sm:$0xf0]  ;;  %v3427_v59 = vld [vmem:[#allocation5 + $0x18] sm:$0xf0]  ;;  %v3625_v60 = vld [vmem:[#allocation5 + $0x1a0] sm:$0xf] }
  0x6b   :  { %1093 = vmatpush.bf16.msra.mxu0 %v3474_v9  ;;  %656 = vmatmul.bf16.vlgmr.msrb.gmra.mxu1 %v5402_v54  ;;  %v4705_v9 = vld [vmem:[#allocation5 + $0x54] sm:$0xf]  ;;  %v3586_v10 = vor.u32 %v4738_v8, %v3585_v7  ;;  %v4748_v62 = vld [vmem:[#allocation5 + $0x1a4] sm:$0xf0]  ;;  %v4715_v63 = vld [vmem:[#allocation5 + $0xa4] sm:$0xf] }
  0x6c   :  { %1106 = vmatpush.bf16.msra.mxu1 %v3538_v14  ;;  %669 = vmatmul.bf16.vlgmr.msrb.gmra.mxu2 %v5400_v51  ;;  %v4702_v51 = vld [vmem:[#allocation5 + $0x34] sm:$0xf0]  ;;  %v3462_v12 = vor.u32 %v4705_v9, %v3459_v11  ;;  %v4756_v14 = vld [vmem:[#allocation5 + $0x1e4] sm:$0xf0]  ;;  %v3626_v1 = vor.u32 %v4748_v62, %v3625_v60  ;;  %v3545_v3 = vld [vmem:[#allocation5 + $0x100] sm:$0xf] }
  0x6d   :  { %682 = vmatmul.bf16.vlgmr.msrb.gmra.mxu3 %v5402_v54  ;;  %1119 = vmatpush.bf16.msra.mxu2 %v3602_v17  ;;  %v3442_v54 = vor.u32 %v4702_v51, %v3441_v34  ;;  %v3658_v16 = vor.u32 %v4756_v14, %v3657_v13  ;;  %v3531_v17 = vld [vmem:[#allocation5 + $0xe8] sm:$0xf0]  ;;  %v3570_v34 = vor.u32 %v4734_v32, %v3569_v31  ;;  %v3443_v51 = vld [vmem:[#allocation5 + $0x38] sm:$0xf0]  ;;  %v4695_v5 = vld [vmem:[#allocation5 + $0x4] sm:$0xf] }
  0x6e   :  { %1132 = vmatpush.bf16.msra.mxu3 %v3666_v4  ;;  %v4728_v4 = vld [vmem:[#allocation5 + $0x104] sm:$0xf0]  ;;  %v3419_v7 = vld [vmem:[#allocation5 + $0x8] sm:$0xf0]  ;;  %v4741_v8 = vld [vmem:[#allocation5 + $0x174] sm:$0xf] }
  0x6f   :  { %1094 = vmatpush.bf16.msra.mxu0 %v3466_v18  ;;  %v3534_v18 = vor.u32 %v4723_v15, %v3531_v17  ;;  %v3603_v9 = vld [vmem:[#allocation5 + $0x178] sm:$0xf0]  ;;  %v4746_v13 = vld [vmem:[#allocation5 + $0x194] sm:$0xf0]  ;;  %v4713_v14 = vld [vmem:[#allocation5 + $0x94] sm:$0xf] }
  0x70   :  { %1107 = vmatpush.bf16.msra.mxu1 %v3530_v23  ;;  %v3451_v23 = vld [vmem:[#allocation5 + $0x48] sm:$0xf0]  ;;  %v3606_v11 = vor.u32 %v4741_v8, %v3603_v9  ;;  %v5415_v17 = vld [vmem:[%s5501_s3] sm:$0xf]  ;;  %v4739_v19 = vld [vmem:[#allocation5 + $0x164] sm:$0xf] }
  0x71   :  { %1120 = vmatpush.bf16.msra.mxu2 %v3594_v26  ;;  %v3454_v24 = vor.u32 %v4703_v21, %v3451_v23  ;;  %v4754_v26 = vld [vmem:[#allocation5 + $0x1d4] sm:$0xf0]  ;;  %v3595_v20 = vld [vmem:[#allocation5 + $0x168] sm:$0xf0]  ;;  %v249_v21 = vperm.slane %v5415_v17, 0  ;;  %v250_v42 = vperm.slane %v5415_v17, 1 }
  0x72   :  { %1133 = vmatpush.bf16.msra.mxu3 %v3658_v16  ;;  %v3650_v28 = vor.u32 %v4754_v26, %v3649_v25  ;;  %v3491_v16 = vld [vmem:[#allocation5 + $0x98] sm:$0xf0]  ;;  %v3609_v23 = vld [vmem:[#allocation5 + $0x180] sm:$0xf]  ;;  %v4711_v25 = vld [vmem:[#allocation5 + $0x84] sm:$0xf] }
  0x73   :  { %1095 = vmatpush.bf16.msra.mxu0 %v3458_v27  ;;  %v4721_v27 = vld [vmem:[#allocation5 + $0xd4] sm:$0xf]  ;;  %v4755_v37 = vld [vmem:[#allocation5 + $0x1e4] sm:$0xf]  ;;  %v3579_v41 = vld [vmem:[#allocation5 + $0x148] sm:$0xf0] }
  0x74   :  { %1108 = vmatpush.bf16.msra.mxu1 %v3522_v30  ;;  %v3526_v30 = vor.u32 %v4721_v27, %v3523_v29  ;;  %v3483_v27 = vld [vmem:[#allocation5 + $0x88] sm:$0xf0]  ;;  %v3667_v29 = vld [vmem:[#allocation5 + $0x1f8] sm:$0xf0]  ;;  %v4737_v32 = vld [vmem:[#allocation5 + $0x154] sm:$0xf] }
  0x75   :  { %1121 = vmatpush.bf16.msra.mxu2 %v3586_v10  ;;  %v3422_v10 = vor.u32 %v4695_v5, %v3419_v7  ;;  %v4751_v60 = vld [vmem:[#allocation5 + $0x1c4] sm:$0xf]  ;;  %v3635_v5 = vld [vmem:[#allocation5 + $0x1b8] sm:$0xf0]  ;;  %v4729_v8 = vld [vmem:[#allocation5 + $0x114] sm:$0xf] }
  0x76   :  { %1134 = vmatpush.bf16.msra.mxu3 %v3650_v28  ;;  %v4757_v28 = vld [vmem:[#allocation5 + $0x1f4] sm:$0xf]  ;;  %v3555_v9 = vld [vmem:[#allocation5 + $0x118] sm:$0xf0] }
  0x77   :  { %1096 = vmatpush.bf16.msra.mxu0 %v3450_v33  ;;  %v4701_v33 = vld [vmem:[#allocation5 + $0x34] sm:$0xf]  ;;  %v3670_v31 = vor.u32 %v4757_v28, %v3667_v29 }
  0x78   :  { %1109 = vmatpush.bf16.msra.mxu1 %v3514_v35  ;;  %v3446_v35 = vor.u32 %v4701_v33, %v3443_v51  ;;  %v3587_v33 = vld [vmem:[#allocation5 + $0x158] sm:$0xf0] }
  0x79   :  { %1122 = vmatpush.bf16.msra.mxu2 %v3578_v22  ;;  %v3598_v22 = vor.u32 %v4739_v19, %v3595_v20  ;;  %v3590_v51 = vor.u32 %v4737_v32, %v3587_v33  ;;  %v4765_v33 = vld [vmem:[#allocation7 + $0x30] sm:$0xff] }
  0x7a   :  { %1135 = vmatpush.bf16.msra.mxu3 %v3642_v38 }
  0x7b   :  { %1097 = vmatpush.bf16.msra.mxu0 %v3442_v54  ;;  %v4719_v54 = vld [vmem:[#allocation5 + $0xc4] sm:$0xf] }
  0x7c   :  { %1110 = vmatpush.bf16.msra.mxu1 %v3506_v40  ;;  %v3518_v40 = vor.u32 %v4719_v54, %v3515_v39  ;;  %v3659_v54 = vld [vmem:[#allocation5 + $0x1e8] sm:$0xf0] }
  0x7d   :  { %1123 = vmatpush.bf16.msra.mxu2 %v3570_v34  ;;  %v3662_v38 = vor.u32 %v4755_v37, %v3659_v54  ;;  %v4764_v37 = vld [vmem:[#allocation7 + $0x28] sm:$0xff] }
  0x7e   :  { %1136 = vmatpush.bf16.msra.mxu3 %v3634_v50  ;;  %v4733_v50 = vld [vmem:[#allocation5 + $0x134] sm:$0xf] }
  0x7f   :  { %1098 = vmatpush.bf16.msra.mxu0 %v3434_v43  ;;  %v4699_v43 = vld [vmem:[#allocation5 + $0x24] sm:$0xf] }
  0x80   :  { %1111 = vmatpush.bf16.msra.mxu1 %v3498_v46  ;;  %v3438_v46 = vor.u32 %v4699_v43, %v3435_v45  ;;  %v4753_v45 = vld [vmem:[#allocation5 + $0x1d4] sm:$0xf] }
  0x81   :  { %1124 = vmatpush.bf16.msra.mxu2 %v3562_v44 }
  0x82   :  { %1137 = vmatpush.bf16.msra.mxu3 %v3626_v1  ;;  %v3563_v1 = vld [vmem:[#allocation5 + $0x128] sm:$0xf0] }
  0x83   :  { %1099 = vmatpush.bf16.msra.mxu0 %v3426_v49  ;;  %v4717_v49 = vld [vmem:[#allocation5 + $0xb4] sm:$0xf] }
  0x84   :  { %1112 = vmatpush.bf16.msra.mxu1 %v3490_v53  ;;  %v3553_v53 = vld [vmem:[#allocation5 + $0x110] sm:$0xf]  ;;  %v3510_v56 = vor.u32 %v4717_v49, %v3507_v52  ;;  %v3571_v52 = vld [vmem:[#allocation5 + $0x138] sm:$0xf0] }
  0x87   :  { %1100 = vmatpush.bf16.msra.mxu0 %v3418_v57  ;;  %v3554_v57 = vor.u32 %v4730_v55, %v3553_v53 }
  0x88   :  { %1113 = vmatpush.bf16.msra.mxu1 %v3482_v0  ;;  %v3499_v0 = vld [vmem:[#allocation5 + $0xa8] sm:$0xf0] }
  0x89   :  { %v3502_v2 = vor.u32 %v4715_v63, %v3499_v0  ;;  %1125 = vmatpush.bf16.msra.mxu2 %v3554_v57  ;;  %v4731_v0 = vld [vmem:[#allocation5 + $0x124] sm:$0xf] }
  0x8b   :  { %1145 = vmatpush.bf16.msrb.mxu0 %v3478_v58  ;;  %v4697_v58 = vld [vmem:[#allocation5 + $0x14] sm:$0xf] }
  0x8c   :  { %1158 = vmatpush.bf16.msrb.mxu1 %v3542_v6  ;;  %v3546_v6 = vor.u32 %v4728_v4, %v3545_v3  ;;  %v3566_v3 = vor.u32 %v4731_v0, %v3563_v1  ;;  %v4749_v4 = vld [vmem:[#allocation5 + $0x1b4] sm:$0xf]  ;;  %v3841_v1 = vld [vmem:[#allocation8 + $0x50] sm:$0xf] }
  0x8d   :  { %v3638_v7 = vor.u32 %v4749_v4, %v3635_v5  ;;  %v4768_v5 = vld [vmem:[#allocation7 + $0x48] sm:$0xff] }
  0x8e   :  { %1126 = vmatpush.bf16.msra.mxu2 %v3546_v6 }
  0x8f   :  { %1146 = vmatpush.bf16.msrb.mxu0 %v3470_v61  ;;  %v3430_v61 = vor.u32 %v4697_v58, %v3427_v59  ;;  %v3574_v58 = vor.u32 %v4733_v50, %v3571_v52  ;;  %v4761_v50 = vld [vmem:[#allocation7 + $0x10] sm:$0xff] }
  0x90   :  { %1159 = vmatpush.bf16.msrb.mxu1 %v3534_v18  ;;  %v3494_v18 = vor.u32 %v4713_v14, %v3491_v16  ;;  %v3627_v14 = vld [vmem:[#allocation5 + $0x1a8] sm:$0xf0]  ;;  %v4773_v52 = vld [vmem:[#allocation7 + $0x70] sm:$0xff] }
  0x91   :  { %v3547_v16 = vld [vmem:[#allocation5 + $0x108] sm:$0xf0] }
  0x92   :  { %1171 = vmatpush.bf16.msrb.mxu2 %v3606_v11 }
  0x93   :  { %1147 = vmatpush.bf16.msrb.mxu0 %v3462_v12  ;;  %v3617_v12 = vld [vmem:[#allocation5 + $0x190] sm:$0xf] }
  0x94   :  { %1160 = vmatpush.bf16.msrb.mxu1 %v3526_v30  ;;  %v3618_v15 = vor.u32 %v4746_v13, %v3617_v12  ;;  %v3486_v30 = vor.u32 %v4711_v25, %v3483_v27  ;;  %v3558_v13 = vor.u32 %v4729_v8, %v3555_v9  ;;  %v3611_v25 = vld [vmem:[#allocation5 + $0x188] sm:$0xf0]  ;;  %v251_v27 = vperm.slane %v5415_v17, 2 }
  0x96   :  { %1138 = vmatpush.bf16.msra.mxu3 %v3618_v15  ;;  %1172 = vmatpush.bf16.msrb.mxu2 %v3598_v22  ;;  %v4727_v15 = vld [vmem:[#allocation5 + $0x104] sm:$0xf]  ;;  %v3619_v22 = vld [vmem:[#allocation5 + $0x198] sm:$0xf0] }
  0x97   :  { %1148 = vmatpush.bf16.msrb.mxu0 %v3454_v24  ;;  %v4744_v24 = vld [vmem:[#allocation5 + $0x184] sm:$0xf0]  ;;  %v3550_v20 = vor.u32 %v4727_v15, %v3547_v16  ;;  %v3859_v15 = vld [vmem:[#allocation8 + $0x78] sm:$0xf0]  ;;  %v3817_v16 = vld [vmem:[#allocation8 + $0x20] sm:$0xf] }
  0x98   :  { %1161 = vmatpush.bf16.msrb.mxu1 %v3518_v40  ;;  %v3610_v26 = vor.u32 %v4744_v24, %v3609_v23  ;;  %v4735_v40 = vld [vmem:[#allocation5 + $0x144] sm:$0xf] }
  0x99   :  { %v3582_v43 = vor.u32 %v4735_v40, %v3579_v41  ;;  %v4743_v24 = vld [vmem:[#allocation5 + $0x184] sm:$0xf] }
  0x9a   :  { %1139 = vmatpush.bf16.msra.mxu3 %v3610_v26  ;;  %1173 = vmatpush.bf16.msrb.mxu2 %v3590_v51  ;;  %v3614_v26 = vor.u32 %v4743_v24, %v3611_v25 }
  0x9b   :  { %1149 = vmatpush.bf16.msrb.mxu0 %v3446_v35 }
  0x9c   :  { %1162 = vmatpush.bf16.msrb.mxu1 %v3510_v56 }
  0x9e   :  { %1184 = vmatpush.bf16.msrb.mxu3 %v3670_v31  ;;  %1174 = vmatpush.bf16.msrb.mxu2 %v3582_v43  ;;  %v4766_v31 = vld [vmem:[#allocation7 + $0x38] sm:$0xff] }
  0x9f   :  { %1150 = vmatpush.bf16.msrb.mxu0 %v3438_v46  ;;  %v3651_v46 = vld [vmem:[#allocation5 + $0x1d8] sm:$0xf0] }
  0xa0   :  { %1163 = vmatpush.bf16.msrb.mxu1 %v3502_v2  ;;  %v3654_v49 = vor.u32 %v4753_v45, %v3651_v46 }
  0xa2   :  { %1185 = vmatpush.bf16.msrb.mxu3 %v3662_v38  ;;  %1175 = vmatpush.bf16.msrb.mxu2 %v3574_v58  ;;  %v3857_v58 = vld [vmem:[#allocation8 + $0x70] sm:$0xf] }
  0xa3   :  { %1151 = vmatpush.bf16.msrb.mxu0 %v3430_v61  ;;  %v3643_v61 = vld [vmem:[#allocation5 + $0x1c8] sm:$0xf0] }
  0xa4   :  { %1164 = vmatpush.bf16.msrb.mxu1 %v3494_v18  ;;  %v3646_v63 = vor.u32 %v4751_v60, %v3643_v61  ;;  %v4770_v61 = vld [vmem:[#allocation7 + $0x58] sm:$0xff] }
  0xa6   :  { %1186 = vmatpush.bf16.msrb.mxu3 %v3654_v49  ;;  %1176 = vmatpush.bf16.msrb.mxu2 %v3566_v3  ;;  %v4774_v49 = vld [vmem:[#allocation7 + $0x78] sm:$0xff]  ;;  %v4769_v3 = vld [vmem:[#allocation7 + $0x50] sm:$0xff] }
  0xa7   :  { %1152 = vmatpush.bf16.msrb.mxu0 %v3422_v10  ;;  %v4747_v10 = vld [vmem:[#allocation5 + $0x1a4] sm:$0xf] }
  0xa8   :  { %1165 = vmatpush.bf16.msrb.mxu1 %v3486_v30  ;;  %v3630_v19 = vor.u32 %v4747_v10, %v3627_v14  ;;  %v4767_v10 = vld [vmem:[#allocation7 + $0x40] sm:$0xff]  ;;  %v4789_v14 = vld [vmem:[#allocation8 + $0x74] sm:$0xf] }
  0xaa   :  { %1187 = vmatpush.bf16.msrb.mxu3 %v3646_v63  ;;  %1177 = vmatpush.bf16.msrb.mxu2 %v3558_v13  ;;  %v4788_v63 = vld [vmem:[#allocation8 + $0x64] sm:$0xf0] }
  0xae   :  { %1188 = vmatpush.bf16.msrb.mxu3 %v3638_v7  ;;  %1178 = vmatpush.bf16.msrb.mxu2 %v3550_v20  ;;  %v4784_v7 = vld [vmem:[#allocation8 + $0x44] sm:$0xf0]  ;;  %v4787_v20 = vld [vmem:[#allocation8 + $0x64] sm:$0xf] }
  0xb2   :  { %1189 = vmatpush.bf16.msrb.mxu3 %v3630_v19  ;;  %v4780_v19 = vld [vmem:[#allocation8 + $0x24] sm:$0xf0] }
  0xc9   :  { %v592_v34 = vpop.f32.mrf.mxu0 }
  0xca   :  { %v593_v35 = vadd.f32 %v592_v34, %v249_v21  ;;  %v605_v36 = vpop.f32.mrf.mxu1  ;;  %v4745_v21 = vld [vmem:[#allocation5 + $0x194] sm:$0xf]  ;;  %v252_v34 = vperm.slane %v5415_v17, 3 }
  0xcb   :  { %v3622_v23 = vor.u32 %v4745_v21, %v3619_v22  ;;  %v3851_v21 = vld [vmem:[#allocation8 + $0x68] sm:$0xf0]  ;;  %v3818_v22 = vor.u32 %v4780_v19, %v3817_v16  ;;  %v4887_v16 = vld [vmem:[#allocation13 + $0x84] sm:$0xf] }
  0xcc   :  { %v606_v39 = vadd.f32 %v605_v36, %v593_v35  ;;  %v3854_v24 = vor.u32 %v4787_v20, %v3851_v21 }
  0xcd   :  { %1190 = vmatpush.bf16.msrb.mxu3 %v3622_v23 }
  0xce   :  { %vm687_vm0 = vcmp.ge.f32.partialorder %v606_v39, 0.0  ;;  %v691_v44 = vmul.f32 0.2, %v606_v39 }
  0xd0   :  { %v695_v47 = vsel %vm687_vm0, %v606_v39, %v691_v44 }
  0xd1   :  { %v618_v48 = vpop.f32.mrf.mxu2  ;;  %v699_v53 = vpack.c.bf16 %v695_v47, %v695_v47  ;;  %v594_v57 = vpop.f32.mrf.mxu0  ;;  %1191 = vmatpush.bf16.msrb.mxu3 %v3614_v26  ;;  %v4763_v47 = vld [vmem:[#allocation7 + $0x20] sm:$0xff]  ;;  %v3809_v26 = vld [vmem:[#allocation8 + $0x10] sm:$0xf] }
  0xd2   :  { %v619_v55 = vadd.f32 %v618_v48, %v250_v42  ;;  %v631_v56 = vpop.f32.mrf.mxu3  ;;  %v607_v59 = vpop.f32.mrf.mxu1  ;;  %v4762_v48 = vld [vmem:[#allocation7 + $0x18] sm:$0xff]  ;;  %v4771_v57 = vld [vmem:[#allocation7 + $0x60] sm:$0xff] }
  0xd3   :  { %1101 = vmatmul.bf16.vlgmr.msra.gmra.mxu0 %v699_v53  ;;  %v4790_v59 = vld [vmem:[#allocation8 + $0x74] sm:$0xf0] }
  0xd4   :  { %v632_v62 = vadd.f32 %v631_v56, %v619_v55  ;;  %1337 = vmatpush.bf16.msra.mxu0 %v4766_v31  ;;  %v4772_v55 = vld [vmem:[#allocation7 + $0x68] sm:$0xff]  ;;  %v4759_v56 = vld [vmem:[#allocation7] sm:$0xff]  ;;  %v3858_v60 = vor.u32 %v4790_v59, %v3857_v58 }
  0xd6   :  { %vm688_vm1 = vcmp.ge.f32.partialorder %v632_v62, 0.0  ;;  %v692_v2 = vmul.f32 0.2, %v632_v62 }
  0xd8   :  { %v696_v6 = vsel %vm688_vm1, %v632_v62, %v692_v2  ;;  %1338 = vmatpush.bf16.msra.mxu0 %v4765_v33  ;;  %v3849_v62 = vld [vmem:[#allocation8 + $0x60] sm:$0xf]  ;;  %v4786_v2 = vld [vmem:[#allocation8 + $0x54] sm:$0xf0] }
  0xd9   :  { %v700_v11 = vpack.c.bf16 %v696_v6, %v696_v6  ;;  %v620_v12 = vpop.f32.mrf.mxu2  ;;  %v3850_v0 = vor.u32 %v4788_v63, %v3849_v62  ;;  %v3842_v4 = vor.u32 %v4786_v2, %v3841_v1  ;;  %v3833_v6 = vld [vmem:[#allocation8 + $0x40] sm:$0xf]  ;;  %v4899_v63 = vld [vmem:[#allocation13 + $0xe4] sm:$0xf] }
  0xda   :  { %v633_v18 = vpop.f32.mrf.mxu3  ;;  %v3834_v9 = vor.u32 %v4784_v7, %v3833_v6  ;;  %v4782_v12 = vld [vmem:[#allocation8 + $0x34] sm:$0xf0]  ;;  %v3801_v33 = vld [vmem:[#allocation8] sm:$0xf]  ;;  %v3963_v6 = vld [vmem:[#allocation13 + $0xd0] sm:$0xf0] }
  0xdb   :  { %1114 = vmatmul.bf16.vlgmr.msra.gmra.mxu1 %v700_v11  ;;  %v3862_v18 = vor.u32 %v4789_v14, %v3859_v15 }
  0xdc   :  { %1339 = vmatpush.bf16.msra.mxu0 %v4764_v37  ;;  %1350 = vmatpush.bf16.msra.mxu1 %v4774_v49  ;;  %v3835_v37 = vld [vmem:[#allocation8 + $0x48] sm:$0xf0] }
  0xe0   :  { %1340 = vmatpush.bf16.msra.mxu0 %v4763_v47  ;;  %1351 = vmatpush.bf16.msra.mxu1 %v4773_v52  ;;  %v767_v47 = vld [vmem:[%s5503_s5] sm:$0x3]  ;;  %v4775_v52 = vld [vmem:[#allocation8 + $0x4] sm:$0xf] }
  0xe1   :  { %v769_v49 = vperm.slane %v767_v47, 0  ;;  %v770_v7 = vperm.slane %v767_v47, 1  ;;  %v4059_v47 = vld [vmem:[#allocation13 + $0x190] sm:$0xf0] }
  0xe3   :  { %1153 = vmatmul.bf16.vlgmr.msrb.gmra.mxu0 %v699_v53  ;;  %v4760_v53 = vld [vmem:[#allocation7 + $0x8] sm:$0xff] }
  0xe4   :  { %1341 = vmatpush.bf16.msra.mxu0 %v4762_v48  ;;  %1352 = vmatpush.bf16.msra.mxu1 %v4772_v55 }
  0xe7   :  { %v644_v28 = vpop.f32.mrf.mxu0 }
  0xe8   :  { %v645_v29 = vadd.f32 %v644_v28, %v251_v27  ;;  %v657_v30 = vpop.f32.mrf.mxu1  ;;  %1342 = vmatpush.bf16.msra.mxu0 %v4761_v50  ;;  %1353 = vmatpush.bf16.msra.mxu1 %v4771_v57  ;;  %v4778_v27 = vld [vmem:[#allocation8 + $0x14] sm:$0xf0]  ;;  %v4785_v28 = vld [vmem:[#allocation8 + $0x54] sm:$0xf] }
  0xea   :  { %v658_v32 = vadd.f32 %v657_v30, %v645_v29  ;;  %v3810_v29 = vor.u32 %v4778_v27, %v3809_v26  ;;  %v3843_v30 = vld [vmem:[#allocation8 + $0x58] sm:$0xf0]  ;;  %v4931_v26 = vld [vmem:[#allocation13 + $0x1e4] sm:$0xf]  ;;  %v4107_v27 = vld [vmem:[#allocation13 + $0x1f0] sm:$0xf0] }
  0xeb   :  { %1166 = vmatmul.bf16.vlgmr.msrb.gmra.mxu1 %v700_v11  ;;  %v3825_v11 = vld [vmem:[#allocation8 + $0x30] sm:$0xf]  ;;  %v3846_v31 = vor.u32 %v4785_v28, %v3843_v30  ;;  %v182_v30 = vld [vmem:[%s5519_s21] sm:$0x1] }
  0xec   :  { %vm689_vm2 = vcmp.ge.f32.partialorder %v658_v32, 0.0  ;;  %v693_v51 = vmul.f32 0.2, %v658_v32  ;;  %1343 = vmatpush.bf16.msra.mxu0 %v4760_v53  ;;  %1354 = vmatpush.bf16.msra.mxu1 %v4770_v61  ;;  %v3826_v13 = vor.u32 %v4782_v12, %v3825_v11  ;;  %v3803_v53 = vld [vmem:[#allocation8 + $0x8] sm:$0xf0] }
  0xed   :  { %v3806_v55 = vor.u32 %v4775_v52, %v3803_v53  ;;  %v4891_v11 = vld [vmem:[#allocation13 + $0xa4] sm:$0xf]  ;;  %v3947_v12 = vld [vmem:[#allocation13 + $0xb0] sm:$0xf0] }
  0xee   :  { %v697_v35 = vsel %vm689_vm2, %v658_v32, %v693_v51  ;;  %v4783_v51 = vld [vmem:[#allocation8 + $0x44] sm:$0xf]  ;;  %v3950_v15 = vor.u32 %v4891_v11, %v3947_v12  ;;  %v3995_v11 = vld [vmem:[#allocation13 + $0x110] sm:$0xf0]  ;;  %v4884_v12 = vld [vmem:[#allocation13 + $0x6c] sm:$0xf] }
  0xef   :  { %v670_v36 = vpop.f32.mrf.mxu2  ;;  %v701_v54 = vpack.c.bf16 %v697_v35, %v697_v35  ;;  %v646_v40 = vpop.f32.mrf.mxu0 }
  0xf0   :  { %v671_v38 = vadd.f32 %v670_v36, %v252_v34  ;;  %v683_v39 = vpop.f32.mrf.mxu3  ;;  %v659_v41 = vpop.f32.mrf.mxu1  ;;  %1344 = vmatpush.bf16.msra.mxu0 %v4759_v56  ;;  %1355 = vmatpush.bf16.msra.mxu1 %v4769_v3  ;;  %v4776_v34 = vld [vmem:[#allocation8 + $0x4] sm:$0xf0] }
  0xf1   :  { %1127 = vmatmul.bf16.vlgmr.msra.gmra.mxu2 %v701_v54  ;;  %v3802_v36 = vor.u32 %v4776_v34, %v3801_v33  ;;  %v4879_v33 = vld [vmem:[#allocation13 + $0x44] sm:$0xf] }
  0xf2   :  { %v684_v42 = vadd.f32 %v683_v39, %v671_v38  ;;  %v4781_v38 = vld [vmem:[#allocation8 + $0x34] sm:$0xf]  ;;  %v3827_v39 = vld [vmem:[#allocation8 + $0x38] sm:$0xf0] }
  0xf3   :  { %v3830_v40 = vor.u32 %v4781_v38, %v3827_v39  ;;  %v4875_v39 = vld [vmem:[#allocation13 + $0x24] sm:$0xf] }
  0xf4   :  { %vm690_vm3 = vcmp.ge.f32.partialorder %v684_v42, 0.0  ;;  %v694_v43 = vmul.f32 0.2, %v684_v42  ;;  %1583 = vmatpush.bf16.msrb.mxu0 %v3858_v60  ;;  %1356 = vmatpush.bf16.msra.mxu1 %v4768_v5  ;;  %v4895_v5 = vld [vmem:[#allocation13 + $0xc4] sm:$0xf] }
  0xf6   :  { %v698_v44 = vsel %vm690_vm3, %v684_v42, %v694_v43  ;;  %v4779_v42 = vld [vmem:[#allocation8 + $0x24] sm:$0xf]  ;;  %v3819_v43 = vld [vmem:[#allocation8 + $0x28] sm:$0xf0] }
  0xf7   :  { %v702_v45 = vpack.c.bf16 %v698_v44, %v698_v44  ;;  %v672_v46 = vpop.f32.mrf.mxu2 }
  0xf8   :  { %v685_v17 = vpop.f32.mrf.mxu3  ;;  %1584 = vmatpush.bf16.msrb.mxu0 %v3850_v0  ;;  %1357 = vmatpush.bf16.msra.mxu1 %v4767_v10  ;;  %v4777_v46 = vld [vmem:[#allocation8 + $0x14] sm:$0xf]  ;;  %v3966_v10 = vor.u32 %v4895_v5, %v3963_v6  ;;  %v4888_v6 = vld [vmem:[#allocation13 + $0x8c] sm:$0xf] }
  0xf9   :  { %1140 = vmatmul.bf16.vlgmr.msra.gmra.mxu3 %v702_v45  ;;  %v3811_v17 = vld [vmem:[#allocation8 + $0x18] sm:$0xf0]  ;;  %v3979_v0 = vld [vmem:[#allocation13 + $0xf0] sm:$0xf0] }
  0xfa   :  { %v3814_v48 = vor.u32 %v4777_v46, %v3811_v17  ;;  %v3982_v3 = vor.u32 %v4899_v63, %v3979_v0  ;;  %v3867_v46 = vld [vmem:[#allocation13 + $0x10] sm:$0xf0]  ;;  %v4919_v17 = vld [vmem:[#allocation13 + $0x184] sm:$0xf]  ;;  %v4892_v63 = vld [vmem:[#allocation13 + $0xac] sm:$0xf] }
  0xfb   :  { %v4062_v52 = vor.u32 %v4919_v17, %v4059_v47  ;;  %v3955_v0 = vld [vmem:[#allocation13 + $0xb8] sm:$0xf0]  ;;  %v4011_v5 = vld [vmem:[#allocation13 + $0x130] sm:$0xf0] }
  0xfc   :  { %1585 = vmatpush.bf16.msrb.mxu0 %v3842_v4  ;;  %1596 = vmatpush.bf16.msrb.mxu1 %v3862_v18  ;;  %v3931_v18 = vld [vmem:[#allocation13 + $0x90] sm:$0xf0]  ;;  %v3779_v17 = vld [vmem:[#allocation10 + $0x58] sm:$0xf0] }
  0xfd   :  { %v3875_v47 = vld [vmem:[#allocation13 + $0x18] sm:$0xf0] }
 0x100   :  { %1586 = vmatpush.bf16.msrb.mxu0 %v3834_v9  ;;  %1597 = vmatpush.bf16.msrb.mxu1 %v3854_v24  ;;  %v4883_v24 = vld [vmem:[#allocation13 + $0x64] sm:$0xf] }
 0x101   :  { %1179 = vmatmul.bf16.vlgmr.msrb.gmra.mxu2 %v701_v54  ;;  %v3838_v54 = vor.u32 %v4783_v51, %v3835_v37  ;;  %v3899_v51 = vld [vmem:[#allocation13 + $0x50] sm:$0xf0] }
 0x104   :  { %1587 = vmatpush.bf16.msrb.mxu0 %v3826_v13  ;;  %1598 = vmatpush.bf16.msrb.mxu1 %v3846_v31 }
 0x108   :  { %1588 = vmatpush.bf16.msrb.mxu0 %v3818_v22  ;;  %1599 = vmatpush.bf16.msrb.mxu1 %v3838_v54  ;;  %v3902_v54 = vor.u32 %v4879_v33, %v3899_v51  ;;  %v3795_v33 = vld [vmem:[#allocation10 + $0x78] sm:$0xf0]  ;;  %v3785_v51 = vld [vmem:[#allocation10 + $0x60] sm:$0xf] }
 0x109   :  { %1192 = vmatmul.bf16.vlgmr.msrb.gmra.mxu3 %v702_v45  ;;  %v3822_v45 = vor.u32 %v4779_v42, %v3819_v43  ;;  %v4075_v42 = vld [vmem:[#allocation13 + $0x1b0] sm:$0xf0] }
 0x10c   :  { %1589 = vmatpush.bf16.msrb.mxu0 %v3810_v29  ;;  %1600 = vmatpush.bf16.msrb.mxu1 %v3830_v40  ;;  %v3883_v40 = vld [vmem:[#allocation13 + $0x30] sm:$0xf0] }
 0x10d   :  { %v3886_v43 = vor.u32 %v4875_v39, %v3883_v40 }
 0x110   :  { %1590 = vmatpush.bf16.msrb.mxu0 %v3802_v36  ;;  %1601 = vmatpush.bf16.msrb.mxu1 %v3822_v45  ;;  %v4091_v36 = vld [vmem:[#allocation13 + $0x1d0] sm:$0xf0]  ;;  %v4871_v45 = vld [vmem:[#allocation13 + $0x4] sm:$0xf] }
 0x114   :  { %1602 = vmatpush.bf16.msrb.mxu1 %v3814_v48  ;;  %v4900_v48 = vld [vmem:[#allocation13 + $0xec] sm:$0xf] }
 0x118   :  { %1603 = vmatpush.bf16.msrb.mxu1 %v3806_v55  ;;  %v4915_v55 = vld [vmem:[#allocation13 + $0x164] sm:$0xf] }
 0x150   :  { %v1102_v8 = vpop.f32.mrf.mxu0 }
 0x151   :  { %v1103_v56 = vadd.f32 %v1102_v8, %v769_v49  ;;  %v3987_v49 = vld [vmem:[#allocation13 + $0xf8] sm:$0xf0] }
 0x152   :  { %v3990_v53 = vor.u32 %v4900_v48, %v3987_v49  ;;  %v4920_v48 = vld [vmem:[#allocation13 + $0x18c] sm:$0xf]  ;;  %v4067_v49 = vld [vmem:[#allocation13 + $0x198] sm:$0xf0] }
 0x158   :  { %v1115_v23 = vpop.f32.mrf.mxu1  ;;  %v1104_v25 = vpop.f32.mrf.mxu0 }
 0x159   :  { %v1116_v58 = vadd.f32 %v1115_v23, %v1103_v56  ;;  %v3934_v23 = vor.u32 %v4887_v16, %v3931_v18  ;;  %v3915_v25 = vld [vmem:[#allocation13 + $0x70] sm:$0xf0] }
 0x15a   :  { %v3918_v31 = vor.u32 %v4883_v24, %v3915_v25  ;;  %v4043_v56 = vld [vmem:[#allocation13 + $0x170] sm:$0xf0]  ;;  %v4876_v24 = vld [vmem:[#allocation13 + $0x2c] sm:$0xf]  ;;  %v3891_v25 = vld [vmem:[#allocation13 + $0x38] sm:$0xf0] }
 0x160   :  { %v1117_v32 = vpop.f32.mrf.mxu1  ;;  %v1154_v35 = vpop.f32.mrf.mxu0 }
 0x161   :  { %v1155_v13 = vadd.f32 %v1154_v35, %v770_v7  ;;  %v4110_v32 = vor.u32 %v4931_v26, %v4107_v27  ;;  %v4927_v35 = vld [vmem:[#allocation13 + $0x1c4] sm:$0xf]  ;;  %v3939_v7 = vld [vmem:[#allocation13 + $0x98] sm:$0xf0]  ;;  %v4924_v26 = vld [vmem:[#allocation13 + $0x1ac] sm:$0xf] }
 0x162   :  { %v4094_v38 = vor.u32 %v4927_v35, %v4091_v36  ;;  %v3793_v27 = vld [vmem:[#allocation10 + $0x70] sm:$0xf]  ;;  %v4804_v35 = vld [vmem:[#allocation10 + $0x64] sm:$0xf0]  ;;  %v4083_v36 = vld [vmem:[#allocation13 + $0x1b8] sm:$0xf0] }
 0x163   :  { %v3786_v39 = vor.u32 %v4804_v35, %v3785_v51  ;;  %v3977_v51 = vld [vmem:[#allocation13 + $0xe0] sm:$0xf]  ;;  %v4901_v35 = vld [vmem:[#allocation13 + $0xec] sm:$0xf0] }
 0x168   :  { %v1167_v41 = vpop.f32.mrf.mxu1  ;;  %v1156_v44 = vpop.f32.mrf.mxu0 }
 0x169   :  { %v1168_v14 = vadd.f32 %v1167_v41, %v1155_v13  ;;  %v4923_v41 = vld [vmem:[#allocation13 + $0x1a4] sm:$0xf]  ;;  %v3923_v13 = vld [vmem:[#allocation13 + $0x78] sm:$0xf0] }
 0x16a   :  { %v4078_v44 = vor.u32 %v4923_v41, %v4075_v42  ;;  %v3926_v18 = vor.u32 %v4884_v12, %v3923_v13  ;;  %v3777_v41 = vld [vmem:[#allocation10 + $0x50] sm:$0xf]  ;;  %v4802_v42 = vld [vmem:[#allocation10 + $0x54] sm:$0xf0]  ;;  %v4795_v13 = vld [vmem:[#allocation10 + $0x24] sm:$0xf] }
 0x170   :  { %v1169_v50 = vpop.f32.mrf.mxu1 }
 0x171   :  { %v3870_v50 = vor.u32 %v4871_v45, %v3867_v46  ;;  %v4872_v45 = vld [vmem:[#allocation13 + $0xc] sm:$0xf]  ;;  %v4801_v46 = vld [vmem:[#allocation10 + $0x54] sm:$0xf] }
 0x174   :  { %v1128_v57 = vpop.f32.mrf.mxu2 }
 0x175   :  { %v1129_v59 = vadd.f32 %v1128_v57, %v1116_v58  ;;  %v4896_v57 = vld [vmem:[#allocation13 + $0xcc] sm:$0xf]  ;;  %v3971_v58 = vld [vmem:[#allocation13 + $0xd8] sm:$0xf0] }
 0x17c   :  { %v1141_v60 = vpop.f32.mrf.mxu3  ;;  %v1130_v62 = vpop.f32.mrf.mxu2 }
 0x17d   :  { %v1142_v61 = vadd.f32 %v1141_v60, %v1129_v59  ;;  %v4046_v59 = vor.u32 %v4915_v55, %v4043_v56  ;;  %v3974_v60 = vor.u32 %v4896_v57, %v3971_v58  ;;  %v4027_v62 = vld [vmem:[#allocation13 + $0x150] sm:$0xf0]  ;;  %v4800_v55 = vld [vmem:[#allocation10 + $0x44] sm:$0xf0]  ;;  %v3878_v56 = vor.u32 %v4872_v45, %v3875_v47  ;;  %v4799_v58 = vld [vmem:[#allocation10 + $0x44] sm:$0xf] }
 0x17e   :  { %v4070_v57 = vor.u32 %v4920_v48, %v4067_v49  ;;  %v4893_v47 = vld [vmem:[#allocation13 + $0xac] sm:$0xf0]  ;;  %v4073_v48 = vld [vmem:[#allocation13 + $0x1a0] sm:$0xf] }
 0x17f   :  { %vm1197_vm4 = vcmp.ge.f32.partialorder %v1142_v61, 0.0  ;;  %v1199_v1 = vmul.f32 0.2, %v1142_v61 }
 0x181   :  { %v1201_v2 = vsel %vm1197_vm4, %v1142_v61, %v1199_v1  ;;  %v4911_v61 = vld [vmem:[#allocation13 + $0x144] sm:$0xf] }
 0x182   :  { %v5424_v4 = vpack.c.bf16 %v1201_v2, %v1201_v2  ;;  %v4030_v1 = vor.u32 %v4911_v61, %v4027_v62  ;;  %v3958_v2 = vor.u32 %v4892_v63, %v3955_v0  ;;  %v4051_v61 = vld [vmem:[#allocation13 + $0x178] sm:$0xf0]  ;;  %v3761_v0 = vld [vmem:[#allocation10 + $0x30] sm:$0xf] }
 0x184   :  { %v1143_v9 = vpop.f32.mrf.mxu3  ;;  %1345 = vmatmul.bf16.vlgmr.msra.gmra.mxu0 %v5424_v4  ;;  %v1180_v8 = vpop.f32.mrf.mxu2 }
 0x185   :  { %2099 = vmatpush.bf16.msra.mxu0 %v3982_v3  ;;  %v1181_v19 = vadd.f32 %v1180_v8, %v1168_v14  ;;  %v4907_v3 = vld [vmem:[#allocation13 + $0x124] sm:$0xf]  ;;  %v3942_v8 = vor.u32 %v4888_v6, %v3939_v7  ;;  %v4932_v14 = vld [vmem:[#allocation13 + $0x1ec] sm:$0xf]  ;;  %v4035_v7 = vld [vmem:[#allocation13 + $0x158] sm:$0xf0] }
 0x186   :  { %v4014_v9 = vor.u32 %v4907_v3, %v4011_v5  ;;  %v4797_v3 = vld [vmem:[#allocation10 + $0x34] sm:$0xf]  ;;  %v3763_v5 = vld [vmem:[#allocation10 + $0x38] sm:$0xf0]  ;;  %v4912_v6 = vld [vmem:[#allocation13 + $0x14c] sm:$0xf] }
 0x187   :  { %v4038_v12 = vor.u32 %v4912_v6, %v4035_v7  ;;  %v4913_v6 = vld [vmem:[#allocation13 + $0x14c] sm:$0xf0] }
 0x189   :  { %2100 = vmatpush.bf16.msra.mxu0 %v3966_v10  ;;  %v4903_v10 = vld [vmem:[#allocation13 + $0x104] sm:$0xf] }
 0x18a   :  { %v3998_v16 = vor.u32 %v4903_v10, %v3995_v11  ;;  %v3753_v10 = vld [vmem:[#allocation10 + $0x20] sm:$0xf]  ;;  %v4796_v11 = vld [vmem:[#allocation10 + $0x24] sm:$0xf0] }
 0x18c   :  { %v1193_v20 = vpop.f32.mrf.mxu3  ;;  %v1182_v22 = vpop.f32.mrf.mxu2 }
 0x18d   :  { %v1194_v21 = vadd.f32 %v1193_v20, %v1181_v19  ;;  %2101 = vmatpush.bf16.msra.mxu0 %v3950_v15  ;;  %v4115_v15 = vld [vmem:[#allocation13 + $0x1f8] sm:$0xf0]  ;;  %v4880_v20 = vld [vmem:[#allocation13 + $0x4c] sm:$0xf] }
 0x18e   :  { %v4118_v19 = vor.u32 %v4932_v14, %v4115_v15  ;;  %v4928_v22 = vld [vmem:[#allocation13 + $0x1cc] sm:$0xf] }
 0x18f   :  { %vm1198_vm5 = vcmp.ge.f32.partialorder %v1194_v21, 0.0  ;;  %v1200_v28 = vmul.f32 0.2, %v1194_v21  ;;  %v3755_v14 = vld [vmem:[#allocation10 + $0x28] sm:$0xf0] }
 0x190   :  { %v4908_v15 = vld [vmem:[#allocation13 + $0x12c] sm:$0xf] }
 0x191   :  { %v1202_v29 = vsel %vm1198_vm5, %v1194_v21, %v1200_v28  ;;  %2102 = vmatpush.bf16.msra.mxu0 %v3934_v23  ;;  %v3907_v21 = vld [vmem:[#allocation13 + $0x58] sm:$0xf0]  ;;  %v4806_v28 = vld [vmem:[#allocation10 + $0x74] sm:$0xf0] }
 0x192   :  { %v5430_v34 = vpack.c.bf16 %v1202_v29, %v1202_v29  ;;  %v4099_v23 = vld [vmem:[#allocation13 + $0x1d8] sm:$0xf0]  ;;  %v4805_v29 = vld [vmem:[#allocation10 + $0x74] sm:$0xf] }
 0x194   :  { %v1195_v37 = vpop.f32.mrf.mxu3  ;;  %1358 = vmatmul.bf16.vlgmr.msra.gmra.mxu1 %v5430_v34  ;;  %1591 = vmatmul.bf16.vlgmr.msrb.gmra.mxu0 %v182_v30 }
 0x195   :  { %2103 = vmatpush.bf16.msra.mxu0 %v3918_v31  ;;  %2112 = vmatpush.bf16.msra.mxu1 %v4110_v32  ;;  %v4102_v31 = vor.u32 %v4928_v22, %v4099_v23  ;;  %v3794_v32 = vor.u32 %v4806_v28, %v3793_v27  ;;  %v3798_v37 = vor.u32 %v4805_v29, %v3795_v33  ;;  %v4793_v23 = vld [vmem:[#allocation10 + $0x14] sm:$0xf]  ;;  %v3737_v29 = vld [vmem:[#allocation10] sm:$0xf]  ;;  %v3739_v33 = vld [vmem:[#allocation10 + $0x8] sm:$0xf0] }
 0x197   :  { %1477 = vmatpush.bf16.msra.mxu2 %v3794_v32  ;;  %1490 = vmatpush.bf16.msra.mxu3 %v3798_v37  ;;  %v4791_v32 = vld [vmem:[#allocation10 + $0x4] sm:$0xf]  ;;  %v4933_v37 = vld [vmem:[#allocation13 + $0x1ec] sm:$0xf0] }
 0x199   :  { %2104 = vmatpush.bf16.msra.mxu0 %v3902_v54  ;;  %2113 = vmatpush.bf16.msra.mxu1 %v4094_v38  ;;  %v4803_v54 = vld [vmem:[#allocation10 + $0x64] sm:$0xf]  ;;  %v3787_v38 = vld [vmem:[#allocation10 + $0x68] sm:$0xf0] }
 0x19a   :  { %v3790_v40 = vor.u32 %v4803_v54, %v3787_v38  ;;  %v3742_v38 = vor.u32 %v4791_v32, %v3739_v33 }
 0x19b   :  { %1478 = vmatpush.bf16.msra.mxu2 %v3786_v39  ;;  %v3978_v39 = vor.u32 %v4901_v35, %v3977_v51  ;;  %v3969_v35 = vld [vmem:[#allocation13 + $0xc8] sm:$0xf] }
 0x19c   :  { %1491 = vmatpush.bf16.msra.mxu3 %v3790_v40 }
 0x19d   :  { %2105 = vmatpush.bf16.msra.mxu0 %v3886_v43  ;;  %2114 = vmatpush.bf16.msra.mxu1 %v4078_v44  ;;  %v3894_v43 = vor.u32 %v4876_v24, %v3891_v25  ;;  %v4086_v44 = vor.u32 %v4924_v26, %v4083_v36  ;;  %v3747_v24 = vld [vmem:[#allocation10 + $0x18] sm:$0xf0]  ;;  %v4904_v25 = vld [vmem:[#allocation13 + $0x10c] sm:$0xf]  ;;  %v4105_v36 = vld [vmem:[#allocation13 + $0x1e0] sm:$0xf] }
 0x19e   :  { %v4003_v26 = vld [vmem:[#allocation13 + $0x118] sm:$0xf0]  ;;  %v3750_v28 = vor.u32 %v4793_v23, %v3747_v24  ;;  %v4106_v40 = vor.u32 %v4933_v37, %v4105_v36  ;;  %v5014_v24 = vld [vmem:[%s5505_s7] ss:$0 sm:$0xff] }
 0x19f   :  { %v4898_v36 = vld [vmem:[#allocation13 + $0xd4] sm:$0xf0] }
 0x1a1   :  { %2106 = vmatpush.bf16.msra.mxu0 %v3870_v50  ;;  %2115 = vmatpush.bf16.msra.mxu1 %v4062_v52  ;;  %v3778_v50 = vor.u32 %v4802_v42, %v3777_v41  ;;  %v3782_v52 = vor.u32 %v4801_v46, %v3779_v17  ;;  %v3961_v41 = vld [vmem:[#allocation13 + $0xc0] sm:$0xf]  ;;  %v4897_v42 = vld [vmem:[#allocation13 + $0xcc] sm:$0xf0] }
 0x1a2   :  { %v3962_v45 = vor.u32 %v4897_v42, %v3961_v41  ;;  %v3945_v17 = vld [vmem:[#allocation13 + $0xa0] sm:$0xf]  ;;  %v3953_v41 = vld [vmem:[#allocation13 + $0xa8] sm:$0xf]  ;;  %v4894_v42 = vld [vmem:[#allocation13 + $0xb4] sm:$0xf0] }
 0x1a3   :  { %1479 = vmatpush.bf16.msra.mxu2 %v3778_v50  ;;  %1492 = vmatpush.bf16.msra.mxu3 %v3782_v52  ;;  %v3946_v49 = vor.u32 %v4893_v47, %v3945_v17  ;;  %v4925_v50 = vld [vmem:[#allocation13 + $0x1ac] sm:$0xf0]  ;;  %v3954_v17 = vor.u32 %v4894_v42, %v3953_v41  ;;  %v4831_v41 = vld [vmem:[#allocation11 + $0xc4] sm:$0xf]  ;;  %v4219_v42 = vld [vmem:[#allocation11 + $0xd0] sm:$0xf0] }
 0x1a4   :  { %1604 = vmatmul.bf16.vlgmr.msrb.gmra.mxu1 %v182_v30  ;;  %2107 = vmatmul.bf16.vlgmr.msra.gmra.mxu0 %v5424_v4  ;;  %v3910_v30 = vor.u32 %v4880_v20, %v3907_v21  ;;  %v3745_v20 = vld [vmem:[#allocation10 + $0x10] sm:$0xf]  ;;  %v4794_v21 = vld [vmem:[#allocation10 + $0x14] sm:$0xf0]  ;;  %v4074_v52 = vor.u32 %v4925_v50, %v4073_v48  ;;  %v3937_v48 = vld [vmem:[#allocation13 + $0x88] sm:$0xf] }
 0x1a5   :  { %2151 = vmatpush.bf16.msrb.mxu0 %v3990_v53  ;;  %2116 = vmatpush.bf16.msra.mxu1 %v4046_v59  ;;  %v3769_v53 = vld [vmem:[#allocation10 + $0x40] sm:$0xf]  ;;  %v3771_v59 = vld [vmem:[#allocation10 + $0x48] sm:$0xf0]  ;;  %v3746_v27 = vor.u32 %v4794_v21, %v3745_v20  ;;  %v4905_v20 = vld [vmem:[#allocation13 + $0x10c] sm:$0xf0] }
 0x1a6   :  { %v3770_v62 = vor.u32 %v4800_v55, %v3769_v53  ;;  %v3774_v63 = vor.u32 %v4799_v58, %v3771_v59  ;;  %v3929_v53 = vld [vmem:[#allocation13 + $0x80] sm:$0xf]  ;;  %v4889_v55 = vld [vmem:[#allocation13 + $0x8c] sm:$0xf0]  ;;  %v4065_v50 = vld [vmem:[#allocation13 + $0x188] sm:$0xf] }
 0x1a7   :  { %v4921_v58 = vld [vmem:[#allocation13 + $0x18c] sm:$0xf0] }
 0x1a8   :  { %1480 = vmatpush.bf16.msra.mxu2 %v3770_v62  ;;  %1493 = vmatpush.bf16.msra.mxu3 %v3774_v63  ;;  %v4041_v62 = vld [vmem:[#allocation13 + $0x160] sm:$0xf] }
 0x1a9   :  { %2152 = vmatpush.bf16.msrb.mxu0 %v3974_v60  ;;  %2117 = vmatpush.bf16.msra.mxu1 %v4030_v1  ;;  %v4916_v60 = vld [vmem:[#allocation13 + $0x16c] sm:$0xf]  ;;  %v4798_v1 = vld [vmem:[#allocation10 + $0x34] sm:$0xf0] }
 0x1ad   :  { %2153 = vmatpush.bf16.msrb.mxu0 %v3958_v2  ;;  %2118 = vmatpush.bf16.msra.mxu1 %v4014_v9  ;;  %v4054_v2 = vor.u32 %v4916_v60, %v4051_v61  ;;  %v3762_v9 = vor.u32 %v4798_v1, %v3761_v0  ;;  %v3913_v60 = vld [vmem:[#allocation13 + $0x60] sm:$0xf]  ;;  %v4885_v61 = vld [vmem:[#allocation13 + $0x6c] sm:$0xf0] }
 0x1ae   :  { %v3914_v63 = vor.u32 %v4885_v61, %v3913_v60  ;;  %v4917_v0 = vld [vmem:[#allocation13 + $0x16c] sm:$0xf0]  ;;  %v3897_v1 = vld [vmem:[#allocation13 + $0x40] sm:$0xf] }
 0x1af   :  { %1481 = vmatpush.bf16.msra.mxu2 %v3762_v9 }
 0x1b1   :  { %2154 = vmatpush.bf16.msrb.mxu0 %v3942_v8  ;;  %2119 = vmatpush.bf16.msra.mxu1 %v3998_v16  ;;  %v3766_v8 = vor.u32 %v4797_v3, %v3763_v5  ;;  %v4019_v16 = vld [vmem:[#allocation13 + $0x138] sm:$0xf0]  ;;  %v4042_v3 = vor.u32 %v4917_v0, %v4041_v62  ;;  %v4025_v5 = vld [vmem:[#allocation13 + $0x140] sm:$0xf]  ;;  %v3905_v0 = vld [vmem:[#allocation13 + $0x48] sm:$0xf] }
 0x1b2   :  { %v4022_v22 = vor.u32 %v4908_v15, %v4019_v16  ;;  %v4026_v9 = vor.u32 %v4913_v6, %v4025_v5  ;;  %v3865_v15 = vld [vmem:[#allocation13] sm:$0xf]  ;;  %v4873_v16 = vld [vmem:[#allocation13 + $0xc] sm:$0xf0] }
 0x1b3   :  { %1494 = vmatpush.bf16.msra.mxu3 %v3766_v8  ;;  %v3881_v8 = vld [vmem:[#allocation13 + $0x20] sm:$0xf] }
 0x1b4   :  { %2120 = vmatmul.bf16.vlgmr.msra.gmra.mxu1 %v5430_v34 }
 0x1b5   :  { %2155 = vmatpush.bf16.msrb.mxu0 %v3926_v18  ;;  %2164 = vmatpush.bf16.msrb.mxu1 %v4118_v19  ;;  %v3754_v18 = vor.u32 %v4796_v11, %v3753_v10  ;;  %v3758_v19 = vor.u32 %v4795_v13, %v3755_v14  ;;  %v4877_v10 = vld [vmem:[#allocation13 + $0x2c] sm:$0xf0]  ;;  %v4009_v11 = vld [vmem:[#allocation13 + $0x120] sm:$0xf] }
 0x1b6   :  { %v4909_v13 = vld [vmem:[#allocation13 + $0x12c] sm:$0xf0] }
 0x1b7   :  { %1482 = vmatpush.bf16.msra.mxu2 %v3754_v18  ;;  %1495 = vmatpush.bf16.msra.mxu3 %v3758_v19  ;;  %v4010_v14 = vor.u32 %v4909_v13, %v4009_v11  ;;  %v3993_v18 = vld [vmem:[#allocation13 + $0x100] sm:$0xf]  ;;  %v3866_v19 = vor.u32 %v4873_v16, %v3865_v15  ;;  %v3873_v15 = vld [vmem:[#allocation13 + $0x8] sm:$0xf]  ;;  %v4874_v16 = vld [vmem:[#allocation13 + $0x14] sm:$0xf0] }
 0x1b8   :  { %v3994_v21 = vor.u32 %v4905_v20, %v3993_v18  ;;  %v4001_v18 = vld [vmem:[#allocation13 + $0x108] sm:$0xf]  ;;  %v3874_v20 = vor.u32 %v4874_v16, %v3873_v15  ;;  %v4819_v15 = vld [vmem:[#allocation11 + $0x64] sm:$0xf]  ;;  %v4171_v16 = vld [vmem:[#allocation11 + $0x70] sm:$0xf0] }
 0x1b9   :  { %2156 = vmatpush.bf16.msrb.mxu0 %v3910_v30  ;;  %2165 = vmatpush.bf16.msrb.mxu1 %v4102_v31  ;;  %v4792_v30 = vld [vmem:[#allocation10 + $0x4] sm:$0xf0]  ;;  %v4006_v31 = vor.u32 %v4904_v25, %v4003_v26 }
 0x1ba   :  { %v3738_v54 = vor.u32 %v4792_v30, %v3737_v29  ;;  %v3985_v25 = vld [vmem:[#allocation13 + $0xe8] sm:$0xf]  ;;  %v4934_v29 = vld [vmem:[#allocation13 + $0x1f4] sm:$0xf0] }
 0x1bb   :  { %1483 = vmatpush.bf16.msra.mxu2 %v3746_v27  ;;  %1496 = vmatpush.bf16.msra.mxu3 %v3750_v28  ;;  %v4902_v27 = vld [vmem:[#allocation13 + $0xf4] sm:$0xf0]  ;;  %v4113_v28 = vld [vmem:[#allocation13 + $0x1e8] sm:$0xf] }
 0x1bc   :  { %v3986_v33 = vor.u32 %v4902_v27, %v3985_v25  ;;  %v4114_v51 = vor.u32 %v4934_v29, %v4113_v28  ;;  %v4837_v25 = vld [vmem:[#allocation11 + $0xec] sm:$0xf0]  ;;  %v4835_v29 = vld [vmem:[#allocation11 + $0xe4] sm:$0xf] }
 0x1bd   :  { %2157 = vmatpush.bf16.msrb.mxu0 %v3894_v43  ;;  %2166 = vmatpush.bf16.msrb.mxu1 %v4086_v44  ;;  %v4089_v43 = vld [vmem:[#allocation13 + $0x1c0] sm:$0xf]  ;;  %v4929_v44 = vld [vmem:[#allocation13 + $0x1cc] sm:$0xf0] }
 0x1be   :  { %v4090_v46 = vor.u32 %v4929_v44, %v4089_v43  ;;  %v4081_v43 = vld [vmem:[#allocation13 + $0x1a8] sm:$0xf]  ;;  %v4926_v44 = vld [vmem:[#allocation13 + $0x1b4] sm:$0xf0]  ;;  %v4869_v28 = vld [vmem:[#allocation11 + $0x1ec] sm:$0xf0] }
 0x1bf   :  { %1484 = vmatpush.bf16.msra.mxu2 %v3738_v54  ;;  %1497 = vmatpush.bf16.msra.mxu3 %v3742_v38  ;;  %v4097_v54 = vld [vmem:[#allocation13 + $0x1c8] sm:$0xf]  ;;  %v4930_v38 = vld [vmem:[#allocation13 + $0x1d4] sm:$0xf0]  ;;  %v4082_v47 = vor.u32 %v4926_v44, %v4081_v43  ;;  %v4863_v43 = vld [vmem:[#allocation11 + $0x1c4] sm:$0xf]  ;;  %v4222_v44 = vor.u32 %v4831_v41, %v4219_v42 }
 0x1c0   :  { %v4139_v41 = vld [vmem:[#allocation11 + $0x30] sm:$0xf0]  ;;  %v4843_v42 = vld [vmem:[#allocation11 + $0x124] sm:$0xf] }
 0x1c1   :  { %2158 = vmatpush.bf16.msrb.mxu0 %v3878_v56  ;;  %2167 = vmatpush.bf16.msrb.mxu1 %v4070_v57  ;;  %v4057_v56 = vld [vmem:[#allocation13 + $0x180] sm:$0xf]  ;;  %v3930_v57 = vor.u32 %v4889_v55, %v3929_v53 }
 0x1c2   :  { %v4058_v59 = vor.u32 %v4921_v58, %v4057_v56  ;;  %v3921_v56 = vld [vmem:[#allocation13 + $0x68] sm:$0xf] }
 0x1c3   :  { %2073 = vmatpush.bf16.msrb.mxu2 %v3978_v39  ;;  %2086 = vmatpush.bf16.msrb.mxu3 %v4106_v40  ;;  %v3970_v39 = vor.u32 %v4898_v36, %v3969_v35  ;;  %v4098_v40 = vor.u32 %v4930_v38, %v4097_v54  ;;  %v4049_v58 = vld [vmem:[#allocation13 + $0x168] sm:$0xf]  ;;  %v4363_v35 = vld [vmem:[#allocation11 + $0x1f0] sm:$0xf0]  ;;  %v4217_v36 = vld [vmem:[#allocation11 + $0xc0] sm:$0xf] }
 0x1c4   :  { %2159 = vmatmul.bf16.vlgmr.msrb.gmra.mxu0 %v5424_v4  ;;  %v4833_v38 = vld [vmem:[#allocation11 + $0xcc] sm:$0xf0] }
 0x1c5   :  { %2168 = vmatpush.bf16.msrb.mxu1 %v4054_v2  ;;  %v4881_v2 = vld [vmem:[#allocation13 + $0x4c] sm:$0xf0] }
 0x1c6   :  { %v3898_v7 = vor.u32 %v4881_v2, %v3897_v1  ;;  %v4882_v1 = vld [vmem:[#allocation13 + $0x54] sm:$0xf0]  ;;  %v4033_v2 = vld [vmem:[#allocation13 + $0x148] sm:$0xf] }
 0x1c7   :  { %2074 = vmatpush.bf16.msrb.mxu2 %v3962_v45  ;;  %2087 = vmatpush.bf16.msrb.mxu3 %v4090_v46  ;;  %v3906_v5 = vor.u32 %v4882_v1, %v3905_v0  ;;  %v4857_v1 = vld [vmem:[#allocation11 + $0x18c] sm:$0xf0] }
 0x1c9   :  { %2169 = vmatpush.bf16.msrb.mxu1 %v4038_v12  ;;  %v3882_v12 = vor.u32 %v4877_v10, %v3881_v8  ;;  %v4017_v8 = vld [vmem:[#allocation13 + $0x128] sm:$0xf]  ;;  %v4910_v10 = vld [vmem:[#allocation13 + $0x134] sm:$0xf0] }
 0x1cb   :  { %2075 = vmatpush.bf16.msrb.mxu2 %v3946_v49  ;;  %2088 = vmatpush.bf16.msrb.mxu3 %v4074_v52  ;;  %v4890_v49 = vld [vmem:[#allocation13 + $0x94] sm:$0xf0] }
 0x1cc   :  { %v4922_v52 = vld [vmem:[#allocation13 + $0x194] sm:$0xf0]  ;;  %v3938_v53 = vor.u32 %v4890_v49, %v3937_v48  ;;  %v4329_v48 = vld [vmem:[#allocation11 + $0x1a0] sm:$0xf]  ;;  %v4861_v49 = vld [vmem:[#allocation11 + $0x1ac] sm:$0xf0] }
 0x1cd   :  { %2170 = vmatpush.bf16.msrb.mxu1 %v4022_v22  ;;  %v4066_v55 = vor.u32 %v4922_v52, %v4065_v50  ;;  %v4827_v50 = vld [vmem:[#allocation11 + $0xa4] sm:$0xf] }
 0x1cf   :  { %2076 = vmatpush.bf16.msrb.mxu2 %v3930_v57  ;;  %2089 = vmatpush.bf16.msrb.mxu3 %v4058_v59  ;;  %v4886_v57 = vld [vmem:[#allocation13 + $0x74] sm:$0xf0] }
 0x1d0   :  { %v4918_v59 = vld [vmem:[#allocation13 + $0x174] sm:$0xf0]  ;;  %v3922_v62 = vor.u32 %v4886_v57, %v3921_v56  ;;  %v4331_v56 = vld [vmem:[#allocation11 + $0x1b0] sm:$0xf0] }
 0x1d1   :  { %2171 = vmatpush.bf16.msrb.mxu1 %v4006_v31 }
 0x1d3   :  { %2077 = vmatpush.bf16.msrb.mxu2 %v3914_v63  ;;  %2090 = vmatpush.bf16.msrb.mxu3 %v4042_v3  ;;  %v4050_v63 = vor.u32 %v4918_v59, %v4049_v58  ;;  %v4914_v3 = vld [vmem:[#allocation13 + $0x154] sm:$0xf0]  ;;  %v4330_v58 = vor.u32 %v4861_v49, %v4329_v48  ;;  %v4249_v49 = vld [vmem:[#allocation11 + $0x100] sm:$0xf] }
 0x1d4   :  { %2172 = vmatmul.bf16.vlgmr.msrb.gmra.mxu1 %v5430_v34  ;;  %v4034_v6 = vor.u32 %v4914_v3, %v4033_v2  ;;  %v4823_v2 = vld [vmem:[#allocation11 + $0x84] sm:$0xf]  ;;  %v4187_v3 = vld [vmem:[#allocation11 + $0x90] sm:$0xf0] }
 0x1d7   :  { %2078 = vmatpush.bf16.msrb.mxu2 %v3898_v7  ;;  %2091 = vmatpush.bf16.msrb.mxu3 %v4026_v9  ;;  %v3889_v7 = vld [vmem:[#allocation13 + $0x28] sm:$0xf]  ;;  %v4878_v9 = vld [vmem:[#allocation13 + $0x34] sm:$0xf0] }
 0x1d8   :  { %v3890_v13 = vor.u32 %v4878_v9, %v3889_v7 }
 0x1db   :  { %2079 = vmatpush.bf16.msrb.mxu2 %v3882_v12  ;;  %2092 = vmatpush.bf16.msrb.mxu3 %v4010_v14  ;;  %v4018_v14 = vor.u32 %v4910_v10, %v4017_v8  ;;  %v4190_v8 = vor.u32 %v4823_v2, %v4187_v3  ;;  %v4169_v10 = vld [vmem:[#allocation11 + $0x60] sm:$0xf]  ;;  %v4836_v2 = vld [vmem:[#allocation11 + $0xec] sm:$0xf]  ;;  %v4243_v3 = vld [vmem:[#allocation11 + $0xf8] sm:$0xf0] }
 0x1df   :  { %2080 = vmatpush.bf16.msrb.mxu2 %v3866_v19  ;;  %2093 = vmatpush.bf16.msrb.mxu3 %v3994_v21  ;;  %v4906_v19 = vld [vmem:[#allocation13 + $0x114] sm:$0xf0] }
 0x1e0   :  { %v4002_v21 = vor.u32 %v4906_v19, %v4001_v18  ;;  %v4851_v18 = vld [vmem:[#allocation11 + $0x164] sm:$0xf]  ;;  %v4299_v19 = vld [vmem:[#allocation11 + $0x170] sm:$0xf0] }
 0x201   :  { %v1346_v22 = vpop.f32.mrf.mxu0 }
 0x202   :  { %v1347_v26 = vadd.f32 %v5014_v24, %v1346_v22  ;;  %v4233_v24 = vld [vmem:[#allocation11 + $0xe0] sm:$0xf] }
 0x203   :  { %v4234_v27 = vor.u32 %v4837_v25, %v4233_v24  ;;  %v4174_v24 = vor.u32 %v4819_v15, %v4171_v16  ;;  %v4153_v25 = vld [vmem:[#allocation11 + $0x40] sm:$0xf]  ;;  %v4866_v16 = vld [vmem:[#allocation11 + $0x1d4] sm:$0xf0] }
 0x209   :  { %v1348_v23 = vpop.f32.mrf.mxu0 }
 0x211   :  { %v1359_v30 = vpop.f32.mrf.mxu1  ;;  %v5440_v31 = vpop.f32.mrf.mxu0 }
 0x212   :  { %v1360_v32 = vadd.f32 %v1359_v30, %v1347_v26  ;;  %v4361_v26 = vld [vmem:[#allocation11 + $0x1e0] sm:$0xf]  ;;  %v4235_v30 = vld [vmem:[#allocation11 + $0xf0] sm:$0xf0] }
 0x214   :  { %1363 = vst [vmem:[#allocation16] sm:$0x3] %v1360_v32  ;;  %v1364_v37 = vpack.c.bf16 %v1360_v32, %v1360_v32  ;;  %v4362_v32 = vor.u32 %v4869_v28, %v4361_v26  ;;  %v4817_v26 = vld [vmem:[#allocation11 + $0x4c] sm:$0xf0]  ;;  %v4302_v28 = vor.u32 %v4851_v18, %v4299_v19  ;;  %v4832_v18 = vld [vmem:[#allocation11 + $0xcc] sm:$0xf] }
 0x215   :  { %v4227_v19 = vld [vmem:[#allocation11 + $0xd8] sm:$0xf0] }
 0x216   :  { %1485 = vmatmul.bf16.vlgmr.msra.gmra.mxu2 %v1364_v37  ;;  %1498 = vmatmul.bf16.vlgmr.msra.gmra.mxu3 %v1364_v37 }
 0x217   :  { %2125 = vmatpush.bf16.msra.mxu2 %v3986_v33  ;;  %2138 = vmatpush.bf16.msra.mxu3 %v4114_v51  ;;  %v4238_v33 = vor.u32 %v4835_v29, %v4235_v30  ;;  %v4867_v51 = vld [vmem:[#allocation11 + $0x1e4] sm:$0xf]  ;;  %v4849_v29 = vld [vmem:[#allocation11 + $0x14c] sm:$0xf0] }
 0x218   :  { %v4366_v54 = vor.u32 %v4867_v51, %v4363_v35  ;;  %v4815_v30 = vld [vmem:[#allocation11 + $0x44] sm:$0xf]  ;;  %v4283_v51 = vld [vmem:[#allocation11 + $0x150] sm:$0xf0]  ;;  %v4154_v35 = vor.u32 %v4817_v26, %v4153_v25  ;;  %v4230_v26 = vor.u32 %v4832_v18, %v4227_v19  ;;  %v4846_v19 = vld [vmem:[#allocation11 + $0x134] sm:$0xf0] }
 0x219   :  { %v1361_v45 = vpop.f32.mrf.mxu1  ;;  %v1594_v46 = vpop.f32.mrf.mxu0  ;;  %2523 = vmatpush.bf16.msra.mxu0 %v4238_v33  ;;  %v4847_v33 = vld [vmem:[#allocation11 + $0x144] sm:$0xf] }
 0x21a   :  { %2536 = vmatpush.bf16.msra.mxu1 %v4366_v54  ;;  %v4347_v45 = vld [vmem:[#allocation11 + $0x1d0] sm:$0xf0]  ;;  %v4201_v46 = vld [vmem:[#allocation11 + $0xa0] sm:$0xf] }
 0x21b   :  { %2126 = vmatpush.bf16.msra.mxu2 %v3970_v39  ;;  %2139 = vmatpush.bf16.msra.mxu3 %v4098_v40  ;;  %v4345_v39 = vld [vmem:[#allocation11 + $0x1c0] sm:$0xf] }
 0x21c   :  { %v4137_v54 = vld [vmem:[#allocation11 + $0x20] sm:$0xf] }
 0x21d   :  { %2524 = vmatpush.bf16.msra.mxu0 %v4222_v44 }
 0x21f   :  { %2127 = vmatpush.bf16.msra.mxu2 %v3954_v17  ;;  %2140 = vmatpush.bf16.msra.mxu3 %v4082_v47  ;;  %v4829_v17 = vld [vmem:[#allocation11 + $0xac] sm:$0xf0]  ;;  %v4350_v47 = vor.u32 %v4863_v43, %v4347_v45  ;;  %v4267_v43 = vld [vmem:[#allocation11 + $0x130] sm:$0xf0]  ;;  %v4121_v45 = vld [vmem:[#allocation11] sm:$0xf] }
 0x220   :  { %v4202_v52 = vor.u32 %v4829_v17, %v4201_v46  ;;  %v4809_v46 = vld [vmem:[#allocation11 + $0xc] sm:$0xf0] }
 0x221   :  { %v5442_v60 = vpop.f32.mrf.mxu1  ;;  %v2108_v61 = vpop.f32.mrf.mxu0  ;;  %2537 = vmatpush.bf16.msra.mxu1 %v4350_v47 }
 0x223   :  { %2128 = vmatpush.bf16.msra.mxu2 %v3938_v53  ;;  %2141 = vmatpush.bf16.msra.mxu3 %v4066_v55  ;;  %v4203_v53 = vld [vmem:[#allocation11 + $0xb0] sm:$0xf0]  ;;  %v4859_v55 = vld [vmem:[#allocation11 + $0x1a4] sm:$0xf] }
 0x224   :  { %v4206_v59 = vor.u32 %v4827_v50, %v4203_v53  ;;  %v4334_v0 = vor.u32 %v4859_v55, %v4331_v56  ;;  %v4841_v50 = vld [vmem:[#allocation11 + $0x10c] sm:$0xf0]  ;;  %v4270_v55 = vor.u32 %v4843_v42, %v4267_v43  ;;  %v4123_v56 = vld [vmem:[#allocation11 + $0x10] sm:$0xf0]  ;;  %v4858_v42 = vld [vmem:[#allocation11 + $0x194] sm:$0xf0] }
 0x225   :  { %v4824_v43 = vld [vmem:[#allocation11 + $0x8c] sm:$0xf] }
 0x226   :  { %2081 = vmatmul.bf16.vlgmr.msrb.gmra.mxu2 %v5424_v4  ;;  %2094 = vmatmul.bf16.vlgmr.msrb.gmra.mxu3 %v5430_v34 }
 0x227   :  { %2129 = vmatpush.bf16.msra.mxu2 %v3922_v62  ;;  %2142 = vmatpush.bf16.msra.mxu3 %v4050_v63  ;;  %v4825_v62 = vld [vmem:[#allocation11 + $0x8c] sm:$0xf0]  ;;  %v4313_v63 = vld [vmem:[#allocation11 + $0x180] sm:$0xf] }
 0x228   :  { %2525 = vmatpush.bf16.msra.mxu0 %v4206_v59  ;;  %v4314_v9 = vor.u32 %v4857_v1, %v4313_v63  ;;  %2538 = vmatpush.bf16.msra.mxu1 %v4334_v0  ;;  %v4251_v59 = vld [vmem:[#allocation11 + $0x110] sm:$0xf0]  ;;  %v4369_v63 = vld [vmem:[#allocation11 + $0x1e8] sm:$0xf]  ;;  %v4122_v0 = vor.u32 %v4809_v46, %v4121_v45  ;;  %v4870_v1 = vld [vmem:[#allocation11 + $0x1f4] sm:$0xf0] }
 0x229   :  { %v1607_v11 = vpop.f32.mrf.mxu1  ;;  %v2110_v12 = vpop.f32.mrf.mxu0 }
 0x22a   :  { %v4821_v11 = vld [vmem:[#allocation11 + $0x6c] sm:$0xf0]  ;;  %v4297_v12 = vld [vmem:[#allocation11 + $0x160] sm:$0xf] }
 0x22b   :  { %2130 = vmatpush.bf16.msra.mxu2 %v3906_v5  ;;  %2143 = vmatpush.bf16.msra.mxu3 %v4034_v6  ;;  %v4855_v5 = vld [vmem:[#allocation11 + $0x184] sm:$0xf]  ;;  %v4315_v6 = vld [vmem:[#allocation11 + $0x190] sm:$0xf0] }
 0x22c   :  { %2526 = vmatpush.bf16.msra.mxu0 %v4190_v8 }
 0x22f   :  { %2131 = vmatpush.bf16.msra.mxu2 %v3890_v13  ;;  %2144 = vmatpush.bf16.msra.mxu3 %v4018_v14  ;;  %v4318_v13 = vor.u32 %v4855_v5, %v4315_v6  ;;  %v4853_v14 = vld [vmem:[#allocation11 + $0x16c] sm:$0xf0]  ;;  %v4250_v5 = vor.u32 %v4841_v50, %v4249_v49  ;;  %v4177_v49 = vld [vmem:[#allocation11 + $0x68] sm:$0xf]  ;;  %v4822_v50 = vld [vmem:[#allocation11 + $0x74] sm:$0xf0] }
 0x230   :  { %2527 = vmatpush.bf16.msra.mxu0 %v4174_v24 }
 0x231   :  { %v2121_v22 = vpop.f32.mrf.mxu1  ;;  %2539 = vmatpush.bf16.msra.mxu1 %v4318_v13  ;;  %v4834_v13 = vld [vmem:[#allocation11 + $0xd4] sm:$0xf0] }
 0x232   :  { %v5446_v23 = vadd.f32 %v2121_v22, %v2108_v61  ;;  %v4185_v61 = vld [vmem:[#allocation11 + $0x80] sm:$0xf]  ;;  %v4298_v22 = vor.u32 %v4853_v14, %v4297_v12  ;;  %v4225_v12 = vld [vmem:[#allocation11 + $0xc8] sm:$0xf] }
 0x233   :  { %2132 = vmatpush.bf16.msra.mxu2 %v3874_v20  ;;  %2145 = vmatpush.bf16.msra.mxu3 %v4002_v21  ;;  %v4186_v7 = vor.u32 %v4825_v62, %v4185_v61  ;;  %v4170_v20 = vor.u32 %v4821_v11, %v4169_v10  ;;  %v4241_v61 = vld [vmem:[#allocation11 + $0xe8] sm:$0xf]  ;;  %v4838_v62 = vld [vmem:[#allocation11 + $0xf4] sm:$0xf0]  ;;  %v4370_v10 = vor.u32 %v4870_v1, %v4369_v63  ;;  %v4852_v63 = vld [vmem:[#allocation11 + $0x16c] sm:$0xf] }
 0x234   :  { %v4242_v8 = vor.u32 %v4838_v62, %v4241_v61  ;;  %v4246_v11 = vor.u32 %v4836_v2, %v4243_v3  ;;  %v4353_v14 = vld [vmem:[#allocation11 + $0x1c8] sm:$0xf]  ;;  %v4226_v24 = vor.u32 %v4834_v13, %v4225_v12  ;;  %v4818_v3 = vld [vmem:[#allocation11 + $0x54] sm:$0xf0]  ;;  %v4291_v12 = vld [vmem:[#allocation11 + $0x158] sm:$0xf0] }
 0x235   :  { %2540 = vmatpush.bf16.msra.mxu1 %v4302_v28  ;;  %v4354_v25 = vor.u32 %v4866_v16, %v4353_v14  ;;  %v4209_v28 = vld [vmem:[#allocation11 + $0xa8] sm:$0xf] }
 0x236   :  { %2133 = vmatmul.bf16.vlgmr.msra.gmra.mxu2 %v5424_v4  ;;  %2146 = vmatmul.bf16.vlgmr.msra.gmra.mxu3 %v5430_v34  ;;  %v4865_v4 = vld [vmem:[#allocation11 + $0x1cc] sm:$0xf0]  ;;  %v4218_v34 = vor.u32 %v4833_v38, %v4217_v36  ;;  %v4161_v1 = vld [vmem:[#allocation11 + $0x48] sm:$0xf] }
 0x237   :  { %2497 = vmatpush.bf16.msrb.mxu2 %v4234_v27  ;;  %2510 = vmatpush.bf16.msrb.mxu3 %v4362_v32  ;;  %v4346_v40 = vor.u32 %v4865_v4, %v4345_v39  ;;  %v4281_v27 = vld [vmem:[#allocation11 + $0x140] sm:$0xf]  ;;  %v4155_v32 = vld [vmem:[#allocation11 + $0x50] sm:$0xf0]  ;;  %v4813_v38 = vld [vmem:[#allocation11 + $0x2c] sm:$0xf0]  ;;  %v4286_v4 = vor.u32 %v4847_v33, %v4283_v51 }
 0x238   :  { %v4282_v36 = vor.u32 %v4849_v29, %v4281_v27  ;;  %v4265_v39 = vld [vmem:[#allocation11 + $0x120] sm:$0xf]  ;;  %v4138_v44 = vor.u32 %v4813_v38, %v4137_v54  ;;  %v4830_v29 = vld [vmem:[#allocation11 + $0xb4] sm:$0xf0]  ;;  %v4339_v38 = vld [vmem:[#allocation11 + $0x1b8] sm:$0xf0] }
 0x239   :  { %v2123_v37 = vpop.f32.mrf.mxu1  ;;  %2541 = vmatpush.bf16.msra.mxu1 %v4286_v4  ;;  %v4862_v33 = vld [vmem:[#allocation11 + $0x1b4] sm:$0xf0]  ;;  %v4193_v4 = vld [vmem:[#allocation11 + $0x88] sm:$0xf] }
 0x23a   :  { %v4158_v37 = vor.u32 %v4815_v30, %v4155_v32  ;;  %v4210_v30 = vor.u32 %v4830_v29, %v4209_v28  ;;  %v4337_v32 = vld [vmem:[#allocation11 + $0x1a8] sm:$0xf]  ;;  %v4810_v29 = vld [vmem:[#allocation11 + $0x14] sm:$0xf0] }
 0x23b   :  { %2498 = vmatpush.bf16.msrb.mxu2 %v4218_v34  ;;  %2511 = vmatpush.bf16.msrb.mxu3 %v4346_v40  ;;  %v4845_v34 = vld [vmem:[#allocation11 + $0x12c] sm:$0xf0]  ;;  %v4811_v40 = vld [vmem:[#allocation11 + $0x24] sm:$0xf]  ;;  %v4338_v51 = vor.u32 %v4862_v33, %v4337_v32  ;;  %v4145_v14 = vld [vmem:[#allocation11 + $0x28] sm:$0xf] }
 0x23c   :  { %2528 = vmatpush.bf16.msra.mxu0 %v4158_v37  ;;  %v4266_v47 = vor.u32 %v4845_v34, %v4265_v39  ;;  %v4142_v48 = vor.u32 %v4811_v40, %v4139_v41  ;;  %v4860_v37 = vld [vmem:[#allocation11 + $0x1ac] sm:$0xf]  ;;  %v4826_v34 = vld [vmem:[#allocation11 + $0x94] sm:$0xf0]  ;;  %v4321_v40 = vld [vmem:[#allocation11 + $0x188] sm:$0xf] }
 0x23d   :  { %2542 = vmatpush.bf16.msra.mxu1 %v4270_v55  ;;  %v4342_v39 = vor.u32 %v4860_v37, %v4339_v38  ;;  %v4194_v41 = vor.u32 %v4826_v34, %v4193_v4  ;;  %v4322_v45 = vor.u32 %v4858_v42, %v4321_v40  ;;  %v4178_v55 = vor.u32 %v4822_v50, %v4177_v49  ;;  %v4273_v16 = vld [vmem:[#allocation11 + $0x128] sm:$0xf]  ;;  %v4842_v32 = vld [vmem:[#allocation11 + $0x114] sm:$0xf0]  ;;  %v4840_v37 = vld [vmem:[#allocation11 + $0x10c] sm:$0xf] }
 0x23e   :  { %v4259_v38 = vld [vmem:[#allocation11 + $0x118] sm:$0xf0]  ;;  %v1609_v4 = vld [vmem:[%s5508_s10] sm:$0x3] }
 0x23f   :  { %2499 = vmatpush.bf16.msrb.mxu2 %v4202_v52  ;;  %2512 = vmatpush.bf16.msrb.mxu3 %v4330_v58  ;;  %v4807_v52 = vld [vmem:[#allocation11 + $0x4] sm:$0xf]  ;;  %v1611_v34 = vperm.slane %v1609_v4, 0  ;;  %v1612_v40 = vperm.slane %v1609_v4, 1 }
 0x240   :  { %v4839_v58 = vld [vmem:[#allocation11 + $0x104] sm:$0xf]  ;;  %2529 = vmatpush.bf16.msra.mxu0 %v4142_v48  ;;  %v4126_v6 = vor.u32 %v4807_v52, %v4123_v56  ;;  %v4305_v52 = vld [vmem:[#allocation11 + $0x168] sm:$0xf]  ;;  %v4854_v56 = vld [vmem:[#allocation11 + $0x174] sm:$0xf0] }
 0x241   :  { %v5450_v57 = vpop.f32.mrf.mxu0  ;;  %v4306_v61 = vor.u32 %v4854_v56, %v4305_v52 }
 0x243   :  { %2500 = vmatpush.bf16.msrb.mxu2 %v4186_v7  ;;  %2513 = vmatpush.bf16.msrb.mxu3 %v4314_v9  ;;  %v4868_v7 = vld [vmem:[#allocation11 + $0x1ec] sm:$0xf]  ;;  %v4254_v9 = vor.u32 %v4839_v58, %v4251_v59  ;;  %v4179_v59 = vld [vmem:[#allocation11 + $0x78] sm:$0xf0] }
 0x244   :  { %2530 = vmatpush.bf16.msra.mxu0 %v4126_v6  ;;  %v4820_v58 = vld [vmem:[#allocation11 + $0x6c] sm:$0xf]  ;;  %v4850_v6 = vld [vmem:[#allocation11 + $0x154] sm:$0xf0] }
 0x245   :  { %2543 = vmatpush.bf16.msra.mxu1 %v4254_v9  ;;  %v4182_v62 = vor.u32 %v4820_v58, %v4179_v59  ;;  %v4816_v9 = vld [vmem:[#allocation11 + $0x4c] sm:$0xf]  ;;  %v4497_v58 = vld [vmem:[#allocation14 + $0xf0] sm:$0xf]  ;;  %v4966_v59 = vld [vmem:[#allocation14 + $0xf4] sm:$0xf0] }
 0x247   :  { %2501 = vmatpush.bf16.msrb.mxu2 %v4170_v20  ;;  %2514 = vmatpush.bf16.msrb.mxu3 %v4298_v22  ;;  %v4355_v22 = vld [vmem:[#allocation11 + $0x1d8] sm:$0xf0] }
 0x248   :  { %2575 = vmatpush.bf16.msrb.mxu0 %v4246_v11 }
 0x249   :  { %v2162_v21 = vpop.f32.mrf.mxu0 }
 0x24a   :  { %v4864_v21 = vld [vmem:[#allocation11 + $0x1cc] sm:$0xf] }
 0x24b   :  { %2502 = vmatpush.bf16.msrb.mxu2 %v4154_v35  ;;  %2515 = vmatpush.bf16.msrb.mxu3 %v4282_v36  ;;  %v4358_v27 = vor.u32 %v4864_v21, %v4355_v22  ;;  %v4828_v35 = vld [vmem:[#allocation11 + $0xac] sm:$0xf]  ;;  %v4211_v36 = vld [vmem:[#allocation11 + $0xb8] sm:$0xf0]  ;;  %v4274_v22 = vor.u32 %v4846_v19, %v4273_v16  ;;  %v4960_v19 = vld [vmem:[#allocation14 + $0xc4] sm:$0xf0] }
 0x24c   :  { %2576 = vmatpush.bf16.msrb.mxu0 %v4230_v26  ;;  %v4214_v54 = vor.u32 %v4828_v35, %v4211_v36  ;;  %v4147_v21 = vld [vmem:[#allocation11 + $0x38] sm:$0xf0]  ;;  %v4808_v35 = vld [vmem:[#allocation11 + $0xc] sm:$0xf] }
 0x24d   :  { %v4275_v26 = vld [vmem:[#allocation11 + $0x138] sm:$0xf0] }
 0x24e   :  { %v4131_v36 = vld [vmem:[#allocation11 + $0x18] sm:$0xf0] }
 0x24f   :  { %2503 = vmatpush.bf16.msrb.mxu2 %v4138_v44  ;;  %2516 = vmatpush.bf16.msrb.mxu3 %v4266_v47  ;;  %v4195_v44 = vld [vmem:[#allocation11 + $0x98] sm:$0xf0] }
 0x250   :  { %2577 = vmatpush.bf16.msrb.mxu0 %v4214_v54  ;;  %v4198_v46 = vor.u32 %v4824_v43, %v4195_v44  ;;  %v4323_v47 = vld [vmem:[#allocation11 + $0x198] sm:$0xf0]  ;;  %v4134_v54 = vor.u32 %v4808_v35, %v4131_v36  ;;  %v4465_v35 = vld [vmem:[#allocation14 + $0xb0] sm:$0xf] }
 0x251   :  { %v2173_v17 = vpop.f32.mrf.mxu1 }
 0x252   :  { %v5453_v53 = vadd.f32 %v2173_v17, %v5450_v57  ;;  %v4371_v57 = vld [vmem:[#allocation11 + $0x1f8] sm:$0xf0]  ;;  %v4856_v17 = vld [vmem:[#allocation11 + $0x18c] sm:$0xf] }
 0x253   :  { %2504 = vmatpush.bf16.msrb.mxu2 %v4122_v0  ;;  %v4374_v15 = vor.u32 %v4868_v7, %v4371_v57  ;;  %2517 = vmatpush.bf16.msrb.mxu3 %v4250_v5  ;;  %v4326_v48 = vor.u32 %v4856_v17, %v4323_v47  ;;  %v4307_v0 = vld [vmem:[#allocation11 + $0x178] sm:$0xf0]  ;;  %v4289_v5 = vld [vmem:[#allocation11 + $0x148] sm:$0xf]  ;;  %v4162_v7 = vor.u32 %v4818_v3, %v4161_v1  ;;  %v4425_v1 = vld [vmem:[#allocation14 + $0x60] sm:$0xf] }
 0x254   :  { %2578 = vmatpush.bf16.msrb.mxu0 %v4198_v46  ;;  %v4310_v2 = vor.u32 %v4852_v63, %v4307_v0  ;;  %v4290_v57 = vor.u32 %v4850_v6, %v4289_v5  ;;  %v4950_v63 = vld [vmem:[#allocation14 + $0x74] sm:$0xf0]  ;;  %v4481_v5 = vld [vmem:[#allocation14 + $0xd0] sm:$0xf] }
 0x255   :  { %2588 = vmatpush.bf16.msrb.mxu1 %v4374_v15  ;;  %v4814_v15 = vld [vmem:[#allocation11 + $0x34] sm:$0xf0] }
 0x256   :  { %v4146_v18 = vor.u32 %v4814_v15, %v4145_v14  ;;  %v4962_v6 = vld [vmem:[#allocation14 + $0xd4] sm:$0xf0] }
 0x257   :  { %2549 = vmatpush.bf16.msra.mxu2 %v4242_v8  ;;  %2562 = vmatpush.bf16.msra.mxu3 %v4370_v10  ;;  %v4163_v8 = vld [vmem:[#allocation11 + $0x58] sm:$0xf0]  ;;  %v4848_v10 = vld [vmem:[#allocation11 + $0x14c] sm:$0xf]  ;;  %v4482_v16 = vor.u32 %v4962_v6, %v4481_v5  ;;  %v4965_v5 = vld [vmem:[#allocation14 + $0xf4] sm:$0xf] }
 0x258   :  { %2579 = vmatpush.bf16.msrb.mxu0 %v4182_v62  ;;  %v4166_v11 = vor.u32 %v4816_v9, %v4163_v8  ;;  %v4294_v13 = vor.u32 %v4848_v10, %v4291_v12  ;;  %v4964_v62 = vld [vmem:[#allocation14 + $0xe4] sm:$0xf0]  ;;  %v4946_v9 = vld [vmem:[#allocation14 + $0x54] sm:$0xf0]  ;;  %v4625_v8 = vld [vmem:[#allocation14 + $0x1f0] sm:$0xf] }
 0x259   :  { %v2175_v20 = vpop.f32.mrf.mxu1  ;;  %2589 = vmatpush.bf16.msrb.mxu1 %v4358_v27  ;;  %v4129_v27 = vld [vmem:[#allocation11 + $0x8] sm:$0xf]  ;;  %v4998_v10 = vld [vmem:[#allocation14 + $0x1f4] sm:$0xf0]  ;;  %v4617_v12 = vld [vmem:[#allocation14 + $0x1e0] sm:$0xf] }
 0x25a   :  { %v4812_v20 = vld [vmem:[#allocation11 + $0x2c] sm:$0xf]  ;;  %v4130_v33 = vor.u32 %v4810_v29, %v4129_v27  ;;  %v4982_v27 = vld [vmem:[#allocation14 + $0x174] sm:$0xf0]  ;;  %v4609_v29 = vld [vmem:[#allocation14 + $0x1d0] sm:$0xf] }
 0x25b   :  { %2550 = vmatpush.bf16.msra.mxu2 %v4226_v24  ;;  %2563 = vmatpush.bf16.msra.mxu3 %v4354_v25  ;;  %v4150_v24 = vor.u32 %v4812_v20, %v4147_v21  ;;  %v4844_v25 = vld [vmem:[#allocation11 + $0x12c] sm:$0xf]  ;;  %v4561_v21 = vld [vmem:[#allocation14 + $0x170] sm:$0xf]  ;;  %v4499_v6 = vld [vmem:[#allocation14 + $0xf8] sm:$0xf0] }
 0x25c   :  { %2580 = vmatpush.bf16.msrb.mxu0 %v4166_v11  ;;  %v4278_v28 = vor.u32 %v4844_v25, %v4275_v26  ;;  %v4626_v11 = vor.u32 %v4998_v10, %v4625_v8  ;;  %v4944_v25 = vld [vmem:[#allocation14 + $0x44] sm:$0xf0]  ;;  %v4593_v10 = vld [vmem:[#allocation14 + $0x1b0] sm:$0xf] }
 0x25d   :  { %2590 = vmatpush.bf16.msrb.mxu1 %v4342_v39  ;;  %v4262_v39 = vor.u32 %v4840_v37, %v4259_v38  ;;  %v4958_v37 = vld [vmem:[#allocation14 + $0xb4] sm:$0xf0] }
 0x25e   :  { %v4942_v38 = vld [vmem:[#allocation14 + $0x34] sm:$0xf0] }
 0x25f   :  { %2551 = vmatpush.bf16.msra.mxu2 %v4210_v30  ;;  %2564 = vmatpush.bf16.msra.mxu3 %v4338_v51  ;;  %v4257_v30 = vld [vmem:[#allocation11 + $0x108] sm:$0xf] }
 0x260   :  { %v4258_v51 = vor.u32 %v4842_v32, %v4257_v30  ;;  %2581 = vmatpush.bf16.msrb.mxu0 %v4150_v24  ;;  %v4409_v24 = vld [vmem:[#allocation14 + $0x40] sm:$0xf]  ;;  %v4994_v30 = vld [vmem:[#allocation14 + $0x1d4] sm:$0xf0] }
 0x261   :  { %2591 = vmatpush.bf16.msrb.mxu1 %v4326_v48  ;;  %v4553_v32 = vld [vmem:[#allocation14 + $0x160] sm:$0xf]  ;;  %v4410_v36 = vor.u32 %v4944_v25, %v4409_v24  ;;  %v4949_v24 = vld [vmem:[#allocation14 + $0x74] sm:$0xf]  ;;  %v4435_v25 = vld [vmem:[#allocation14 + $0x78] sm:$0xf0] }
 0x263   :  { %2552 = vmatpush.bf16.msra.mxu2 %v4194_v41  ;;  %2565 = vmatpush.bf16.msra.mxu3 %v4322_v45 }
 0x264   :  { %2582 = vmatpush.bf16.msrb.mxu0 %v4134_v54  ;;  %v4401_v54 = vld [vmem:[#allocation14 + $0x30] sm:$0xf] }
 0x265   :  { %2592 = vmatpush.bf16.msrb.mxu1 %v4310_v2  ;;  %v4948_v2 = vld [vmem:[#allocation14 + $0x64] sm:$0xf0] }
 0x267   :  { %2553 = vmatpush.bf16.msra.mxu2 %v4178_v55  ;;  %2566 = vmatpush.bf16.msra.mxu3 %v4306_v61  ;;  %v4489_v61 = vld [vmem:[#allocation14 + $0xe0] sm:$0xf] }
 0x268   :  { %v4490_v3 = vor.u32 %v4964_v62, %v4489_v61  ;;  %v4385_v62 = vld [vmem:[#allocation14 + $0x10] sm:$0xf] }
 0x269   :  { %2593 = vmatpush.bf16.msrb.mxu1 %v4294_v13  ;;  %v4996_v13 = vld [vmem:[#allocation14 + $0x1e4] sm:$0xf0] }
 0x26a   :  { %v4618_v26 = vor.u32 %v4996_v13, %v4617_v12  ;;  %v4963_v13 = vld [vmem:[#allocation14 + $0xe4] sm:$0xf] }
 0x26b   :  { %2554 = vmatpush.bf16.msra.mxu2 %v4162_v7  ;;  %2567 = vmatpush.bf16.msra.mxu3 %v4290_v57  ;;  %v4426_v7 = vor.u32 %v4948_v2, %v4425_v1  ;;  %v4417_v57 = vld [vmem:[#allocation14 + $0x50] sm:$0xf] }
 0x26c   :  { %v4418_v20 = vor.u32 %v4946_v9, %v4417_v57  ;;  %v4502_v57 = vor.u32 %v4965_v5, %v4499_v6  ;;  %v4955_v5 = vld [vmem:[#allocation14 + $0xa4] sm:$0xf]  ;;  %v4459_v6 = vld [vmem:[#allocation14 + $0xa8] sm:$0xf0] }
 0x26d   :  { %2594 = vmatpush.bf16.msrb.mxu1 %v4278_v28  ;;  %v4562_v28 = vor.u32 %v4982_v27, %v4561_v21  ;;  %v4976_v21 = vld [vmem:[#allocation14 + $0x144] sm:$0xf0]  ;;  %v4438_v27 = vor.u32 %v4949_v24, %v4435_v25  ;;  %v4993_v24 = vld [vmem:[#allocation14 + $0x1d4] sm:$0xf] }
 0x26f   :  { %2555 = vmatpush.bf16.msra.mxu2 %v4146_v18  ;;  %2568 = vmatpush.bf16.msra.mxu3 %v4274_v22  ;;  %v4473_v18 = vld [vmem:[#allocation14 + $0xc0] sm:$0xf] }
 0x271   :  { %2595 = vmatpush.bf16.msrb.mxu1 %v4262_v39  ;;  %v4610_v39 = vor.u32 %v4994_v30, %v4609_v29  ;;  %v4988_v29 = vld [vmem:[#allocation14 + $0x1a4] sm:$0xf0] }
 0x273   :  { %2556 = vmatpush.bf16.msra.mxu2 %v4130_v33  ;;  %2569 = vmatpush.bf16.msra.mxu3 %v4258_v51  ;;  %v4980_v33 = vld [vmem:[#allocation14 + $0x164] sm:$0xf0]  ;;  %v4474_v51 = vor.u32 %v4960_v19, %v4473_v18  ;;  %v4537_v19 = vld [vmem:[#allocation14 + $0x140] sm:$0xf] }
 0x274   :  { %v4554_v4 = vor.u32 %v4980_v33, %v4553_v32  ;;  %v4936_v18 = vld [vmem:[#allocation14 + $0x4] sm:$0xf0]  ;;  %v4961_v32 = vld [vmem:[#allocation14 + $0xd4] sm:$0xf]  ;;  %v4483_v33 = vld [vmem:[#allocation14 + $0xd8] sm:$0xf0] }
 0x299   :  { %v1486_v41 = vpop.f32.mrf.mxu2  ;;  %v1499_v42 = vpop.f32.mrf.mxu3 }
 0x29a   :  { %v1593_v43 = vadd.f32 %v5440_v31, %v1486_v41  ;;  %v1606_v44 = vadd.f32 %v5442_v60, %v1499_v42  ;;  %v4498_v31 = vor.u32 %v4966_v59, %v4497_v58  ;;  %v4433_v60 = vld [vmem:[#allocation14 + $0x70] sm:$0xf]  ;;  %v4978_v42 = vld [vmem:[#allocation14 + $0x154] sm:$0xf0] }
 0x29b   :  { %v4434_v0 = vor.u32 %v4950_v63, %v4433_v60  ;;  %v4545_v41 = vld [vmem:[#allocation14 + $0x150] sm:$0xf]  ;;  %v4938_v60 = vld [vmem:[#allocation14 + $0x14] sm:$0xf0] }
 0x29c   :  { %v1615_v45 = vadd.f32 %v1611_v34, %v1593_v43  ;;  %v1616_v46 = vadd.f32 %v1612_v40, %v1606_v44  ;;  %v4601_v34 = vld [vmem:[#allocation14 + $0x1c0] sm:$0xf]  ;;  %v4992_v40 = vld [vmem:[#allocation14 + $0x1c4] sm:$0xf0]  ;;  %v4449_v59 = vld [vmem:[#allocation14 + $0x90] sm:$0xf]  ;;  %v4386_v2 = vor.u32 %v4938_v60, %v4385_v62 }
 0x29d   :  { %v4627_v62 = vld [vmem:[#allocation14 + $0x1f8] sm:$0xf0]  ;;  %v4513_v60 = vld [vmem:[#allocation14 + $0x110] sm:$0xf] }
 0x29e   :  { %vm1617_vm6 = vcmp.ge.f32.partialorder %v1615_v45, 0.0  ;;  %v1619_v17 = vmul.f32 0.2, %v1615_v45  ;;  %vm1618_vm7 = vcmp.ge.f32.partialorder %v1616_v46, 0.0  ;;  %v1620_v47 = vmul.f32 0.2, %v1616_v46 }
 0x2a0   :  { %v1621_v48 = vsel %vm1617_vm6, %v1615_v45, %v1619_v17  ;;  %v1622_v49 = vsel %vm1618_vm7, %v1616_v46, %v1620_v47  ;;  %v4466_v45 = vor.u32 %v4958_v37, %v4465_v35  ;;  %v4457_v46 = vld [vmem:[#allocation14 + $0xa0] sm:$0xf]  ;;  %v4402_v17 = vor.u32 %v4942_v38, %v4401_v54  ;;  %v4956_v47 = vld [vmem:[#allocation14 + $0xa4] sm:$0xf0]  ;;  %v4529_v35 = vld [vmem:[#allocation14 + $0x130] sm:$0xf] }
 0x2a1   :  { %v5460_v50 = vpack.c.bf16 %v1621_v48, %v1621_v48  ;;  %v5462_v52 = vpack.c.bf16 %v1622_v49, %v1622_v49  ;;  %v1488_v55 = vpop.f32.mrf.mxu2  ;;  %v1501_v56 = vpop.f32.mrf.mxu3  ;;  %v4393_v48 = vld [vmem:[#allocation14 + $0x20] sm:$0xf]  ;;  %v4940_v49 = vld [vmem:[#allocation14 + $0x24] sm:$0xf0]  ;;  %v4458_v58 = vor.u32 %v4956_v47, %v4457_v46  ;;  %v4947_v54 = vld [vmem:[#allocation14 + $0x64] sm:$0xf] }
 0x2a2   :  { %v4602_v55 = vor.u32 %v4992_v40, %v4601_v34  ;;  %v4546_v56 = vor.u32 %v4978_v42, %v4545_v41  ;;  %v4394_v61 = vor.u32 %v4940_v49, %v4393_v48  ;;  %v4427_v38 = vld [vmem:[#allocation14 + $0x68] sm:$0xf0]  ;;  %v4986_v34 = vld [vmem:[#allocation14 + $0x194] sm:$0xf0]  ;;  %v4959_v41 = vld [vmem:[#allocation14 + $0xc4] sm:$0xf] }
 0x2a3   :  { %2505 = vmatmul.bf16.vlgmr.msrb.gmra.mxu2 %v5460_v50  ;;  %2518 = vmatmul.bf16.vlgmr.msrb.gmra.mxu3 %v5462_v52  ;;  %v4475_v42 = vld [vmem:[#allocation14 + $0xc8] sm:$0xf0]  ;;  %v4419_v47 = vld [vmem:[#allocation14 + $0x58] sm:$0xf0]  ;;  %v4569_v49 = vld [vmem:[#allocation14 + $0x180] sm:$0xf] }
 0x2a4   :  { %2531 = vmatmul.bf16.vlgmr.msra.gmra.mxu0 %v5460_v50  ;;  %2544 = vmatmul.bf16.vlgmr.msra.gmra.mxu1 %v5462_v52 }
 0x2a5   :  { %3034 = vmatpush.bf16.msrb.mxu3 %v4498_v31  ;;  %3021 = vmatpush.bf16.msrb.mxu2 %v4434_v0  ;;  %v4954_v31 = vld [vmem:[#allocation14 + $0x94] sm:$0xf0] }
 0x2a6   :  { %3060 = vmatpush.bf16.msra.mxu1 %v4626_v11  ;;  %3047 = vmatpush.bf16.msra.mxu0 %v4562_v28  ;;  %v4450_v1 = vor.u32 %v4954_v31, %v4449_v59  ;;  %v4990_v11 = vld [vmem:[#allocation14 + $0x1b4] sm:$0xf0]  ;;  %v4585_v28 = vld [vmem:[#allocation14 + $0x1a0] sm:$0xf]  ;;  %v4467_v59 = vld [vmem:[#allocation14 + $0xb8] sm:$0xf0] }
 0x2a7   :  { %v4594_v12 = vor.u32 %v4990_v11, %v4593_v10  ;;  %v4586_v30 = vor.u32 %v4988_v29, %v4585_v28  ;;  %v4968_v10 = vld [vmem:[#allocation14 + $0x104] sm:$0xf0]  ;;  %v4939_v28 = vld [vmem:[#allocation14 + $0x24] sm:$0xf]  ;;  %v4395_v29 = vld [vmem:[#allocation14 + $0x28] sm:$0xf0] }
 0x2a9   :  { %v2082_v14 = vpop.f32.mrf.mxu2  ;;  %v2095_v15 = vpop.f32.mrf.mxu3  ;;  %3035 = vmatpush.bf16.msrb.mxu3 %v4490_v3  ;;  %3022 = vmatpush.bf16.msrb.mxu2 %v4426_v7 }
 0x2aa   :  { %v5468_v22 = vadd.f32 %v2095_v15, %v2082_v14  ;;  %3061 = vmatpush.bf16.msra.mxu1 %v4618_v26  ;;  %3048 = vmatpush.bf16.msra.mxu0 %v4554_v4  ;;  %v4491_v14 = vld [vmem:[#allocation14 + $0xe8] sm:$0xf0]  ;;  %v4538_v26 = vor.u32 %v4976_v21, %v4537_v19  ;;  %v4577_v4 = vld [vmem:[#allocation14 + $0x190] sm:$0xf]  ;;  %v4451_v21 = vld [vmem:[#allocation14 + $0x98] sm:$0xf0] }
 0x2ab   :  { %v4494_v15 = vor.u32 %v4963_v13, %v4491_v14  ;;  %v4578_v40 = vor.u32 %v4986_v34, %v4577_v4  ;;  %v4941_v13 = vld [vmem:[#allocation14 + $0x34] sm:$0xf]  ;;  %v4403_v14 = vld [vmem:[#allocation14 + $0x38] sm:$0xf0] }
 0x2ac   :  { %v4937_v4 = vld [vmem:[#allocation14 + $0x14] sm:$0xf]  ;;  %v4387_v34 = vld [vmem:[#allocation14 + $0x18] sm:$0xf0] }
 0x2ad   :  { %3036 = vmatpush.bf16.msrb.mxu3 %v4482_v16  ;;  %3023 = vmatpush.bf16.msrb.mxu2 %v4418_v20  ;;  %v4377_v16 = vld [vmem:[#allocation14] sm:$0xf] }
 0x2ae   :  { %3062 = vmatpush.bf16.msra.mxu1 %v4610_v39  ;;  %3049 = vmatpush.bf16.msra.mxu0 %v4546_v56  ;;  %v4378_v20 = vor.u32 %v4936_v18, %v4377_v16  ;;  %v4430_v39 = vor.u32 %v4947_v54, %v4427_v38  ;;  %v4406_v16 = vor.u32 %v4941_v13, %v4403_v14  ;;  %v4563_v18 = vld [vmem:[#allocation14 + $0x178] sm:$0xf0]  ;;  %v4603_v38 = vld [vmem:[#allocation14 + $0x1c8] sm:$0xf0] }
 0x2b1   :  { %v2084_v43 = vpop.f32.mrf.mxu2  ;;  %v2097_v44 = vpop.f32.mrf.mxu3  ;;  %3037 = vmatpush.bf16.msrb.mxu3 %v4474_v51  ;;  %3024 = vmatpush.bf16.msrb.mxu2 %v4410_v36  ;;  %v4486_v51 = vor.u32 %v4961_v32, %v4483_v33  ;;  %v4974_v36 = vld [vmem:[#allocation14 + $0x134] sm:$0xf0]  ;;  %v4398_v32 = vor.u32 %v4939_v28, %v4395_v29  ;;  %v4555_v33 = vld [vmem:[#allocation14 + $0x168] sm:$0xf0] }
 0x2b2   :  { %3063 = vmatpush.bf16.msra.mxu1 %v4602_v55  ;;  %3050 = vmatpush.bf16.msra.mxu0 %v4538_v26  ;;  %v4530_v37 = vor.u32 %v4974_v36, %v4529_v35  ;;  %v4478_v43 = vor.u32 %v4959_v41, %v4475_v42  ;;  %v4521_v44 = vld [vmem:[#allocation14 + $0x120] sm:$0xf]  ;;  %v4984_v55 = vld [vmem:[#allocation14 + $0x184] sm:$0xf0]  ;;  %v4611_v26 = vld [vmem:[#allocation14 + $0x1d8] sm:$0xf0]  ;;  %v4390_v41 = vor.u32 %v4937_v4, %v4387_v34 }
 0x2b3   :  { %2557 = vmatmul.bf16.vlgmr.msra.gmra.mxu2 %v5460_v50  ;;  %2570 = vmatmul.bf16.vlgmr.msra.gmra.mxu3 %v5462_v52  ;;  %v4570_v56 = vor.u32 %v4984_v55, %v4569_v49  ;;  %v4951_v35 = vld [vmem:[#allocation14 + $0x84] sm:$0xf]  ;;  %v4443_v36 = vld [vmem:[#allocation14 + $0x88] sm:$0xf0]  ;;  %v4547_v42 = vld [vmem:[#allocation14 + $0x158] sm:$0xf0] }
 0x2b4   :  { %2583 = vmatmul.bf16.vlgmr.msrb.gmra.mxu0 %v5460_v50  ;;  %2596 = vmatmul.bf16.vlgmr.msrb.gmra.mxu1 %v5462_v52  ;;  %v4441_v50 = vld [vmem:[#allocation14 + $0x80] sm:$0xf]  ;;  %v4952_v52 = vld [vmem:[#allocation14 + $0x84] sm:$0xf0]  ;;  %v4446_v54 = vor.u32 %v4951_v35, %v4443_v36  ;;  %v5479_v49 = vld [vmem:[%s5511_s13] sm:$0xf] }
 0x2b5   :  { %3038 = vmatpush.bf16.msrb.mxu3 %v4466_v45  ;;  %3025 = vmatpush.bf16.msrb.mxu2 %v4402_v17  ;;  %v4442_v7 = vor.u32 %v4952_v52, %v4441_v50  ;;  %v4972_v45 = vld [vmem:[#allocation14 + $0x124] sm:$0xf0]  ;;  %v4945_v17 = vld [vmem:[#allocation14 + $0x54] sm:$0xf]  ;;  %v4411_v50 = vld [vmem:[#allocation14 + $0x48] sm:$0xf0] }
 0x2b6   :  { %3064 = vmatpush.bf16.msra.mxu1 %v4594_v12  ;;  %3051 = vmatpush.bf16.msra.mxu0 %v4530_v37  ;;  %v4522_v46 = vor.u32 %v4972_v45, %v4521_v44  ;;  %v4422_v48 = vor.u32 %v4945_v17, %v4419_v47  ;;  %v4991_v37 = vld [vmem:[#allocation14 + $0x1c4] sm:$0xf]  ;;  %v4989_v44 = vld [vmem:[#allocation14 + $0x1b4] sm:$0xf]  ;;  %v4595_v45 = vld [vmem:[#allocation14 + $0x1b8] sm:$0xf0] }
 0x2b7   :  { %v4935_v17 = vld [vmem:[#allocation14 + $0x4] sm:$0xf]  ;;  %v4379_v47 = vld [vmem:[#allocation14 + $0x8] sm:$0xf0]  ;;  %v2606_v4 = vperm.slane %v5479_v49, 3  ;;  %s5261_s13 = smov [#allocation16]  }
 0x2b8   :  { %v4382_v55 = vor.u32 %v4935_v17, %v4379_v47  ;;  %s3141_s25 = sshll.u32 %s5261_s13, 4  ;;  %s3142_s25 = int_to_ptr.vmem [resolvable:$true] %s3141_s25 }
 0x2b9   :  { %v2134_v63 = vpop.f32.mrf.mxu2  ;;  %v2147_v0 = vpop.f32.mrf.mxu3  ;;  %3039 = vmatpush.bf16.msrb.mxu3 %v4458_v58  ;;  %3026 = vmatpush.bf16.msrb.mxu2 %v4394_v61  ;;  %v4957_v58 = vld [vmem:[#allocation14 + $0xb4] sm:$0xf]  ;;  %3146 = dma.vmem_to_hbm [thread:$0]  %s3142_s25, 32, %s3144_s30, [#allocation4]  }
 0x2ba   :  { %v5474_v3 = vadd.f32 %v2147_v0, %v2134_v63  ;;  %3065 = vmatpush.bf16.msra.mxu1 %v4586_v30  ;;  %v4997_v61 = vld [vmem:[#allocation14 + $0x1f4] sm:$0xf]  ;;  %3052 = vmatpush.bf16.msra.mxu0 %v4522_v46  ;;  %v4470_v31 = vor.u32 %v4957_v58, %v4467_v59  ;;  %v4970_v63 = vld [vmem:[#allocation14 + $0x114] sm:$0xf0]  ;;  %v4979_v30 = vld [vmem:[#allocation14 + $0x164] sm:$0xf]  ;;  %v4598_v46 = vor.u32 %v4989_v44, %v4595_v45 }
 0x2bb   :  { %v4630_v0 = vor.u32 %v4997_v61, %v4627_v62  ;;  %v4987_v59 = vld [vmem:[#allocation14 + $0x1a4] sm:$0xf]  ;;  %v4587_v61 = vld [vmem:[#allocation14 + $0x1a8] sm:$0xf0]  ;;  %v2605_v44 = vperm.slane %v5479_v49, 2 }
 0x2bd   :  { %3040 = vmatpush.bf16.msrb.mxu3 %v4450_v1  ;;  %3027 = vmatpush.bf16.msrb.mxu2 %v4386_v2  ;;  %v4514_v1 = vor.u32 %v4970_v63, %v4513_v60  ;;  %v4943_v2 = vld [vmem:[#allocation14 + $0x44] sm:$0xf]  ;;  %v2604_v63 = vperm.slane %v5479_v49, 1 }
 0x2be   :  { %3066 = vmatpush.bf16.msra.mxu1 %v4578_v40  ;;  %v4414_v52 = vor.u32 %v4943_v2, %v4411_v50  ;;  %v4977_v40 = vld [vmem:[#allocation14 + $0x154] sm:$0xf] }
 0x2bf   :  { %3053 = vmatpush.bf16.msra.mxu0 %v4514_v1  ;;  %v4531_v1 = vld [vmem:[#allocation14 + $0x138] sm:$0xf0] }
 0x2c1   :  { %v2136_v9 = vpop.f32.mrf.mxu2  ;;  %v2149_v8 = vpop.f32.mrf.mxu3  ;;  %3041 = vmatpush.bf16.msrb.mxu3 %v4442_v7  ;;  %3028 = vmatpush.bf16.msrb.mxu2 %v4378_v20  ;;  %v4995_v7 = vld [vmem:[#allocation14 + $0x1e4] sm:$0xf]  ;;  %v4953_v20 = vld [vmem:[#allocation14 + $0x94] sm:$0xf] }
 0x2c2   :  { %3067 = vmatpush.bf16.msra.mxu1 %v4570_v56  ;;  %v4619_v9 = vld [vmem:[#allocation14 + $0x1e8] sm:$0xf0]  ;;  %v4505_v8 = vld [vmem:[#allocation14 + $0x100] sm:$0xf]  ;;  %v4454_v25 = vor.u32 %v4953_v20, %v4451_v21 }
 0x2c3   :  { %v4622_v11 = vor.u32 %v4995_v7, %v4619_v9  ;;  %v4506_v12 = vor.u32 %v4968_v10, %v4505_v8  ;;  %v4539_v56 = vld [vmem:[#allocation14 + $0x148] sm:$0xf0]  ;;  %v4983_v8 = vld [vmem:[#allocation14 + $0x184] sm:$0xf] }
 0x2c4   :  { %v4571_v10 = vld [vmem:[#allocation14 + $0x188] sm:$0xf0] }
 0x2c5   :  { %3086 = vmatpush.bf16.msra.mxu3 %v4502_v57  ;;  %3073 = vmatpush.bf16.msra.mxu2 %v4438_v27  ;;  %v4462_v57 = vor.u32 %v4955_v5, %v4459_v6  ;;  %v4614_v27 = vor.u32 %v4993_v24, %v4611_v26  ;;  %v4579_v5 = vld [vmem:[#allocation14 + $0x198] sm:$0xf0]  ;;  %v4971_v6 = vld [vmem:[#allocation14 + $0x124] sm:$0xf] }
 0x2c6   :  { %3112 = vmatpush.bf16.msrb.mxu1 %v4630_v0  ;;  %3054 = vmatpush.bf16.msra.mxu0 %v4506_v12  ;;  %v4973_v0 = vld [vmem:[#allocation14 + $0x134] sm:$0xf] }
 0x2c7   :  { %v4534_v50 = vor.u32 %v4973_v0, %v4531_v1 }
 0x2c9   :  { %3087 = vmatpush.bf16.msra.mxu3 %v4494_v15  ;;  %3074 = vmatpush.bf16.msra.mxu2 %v4430_v39  ;;  %v4981_v15 = vld [vmem:[#allocation14 + $0x174] sm:$0xf]  ;;  %v4606_v39 = vor.u32 %v4991_v37, %v4603_v38 }
 0x2ca   :  { %3113 = vmatpush.bf16.msrb.mxu1 %v4622_v11  ;;  %v4566_v19 = vor.u32 %v4981_v15, %v4563_v18  ;;  %v4969_v15 = vld [vmem:[#allocation14 + $0x114] sm:$0xf] }
 0x2cc   :  { %3099 = vmatpush.bf16.msrb.mxu0 %v4566_v19  ;;  %v4574_v19 = vor.u32 %v4983_v8, %v4571_v10 }
 0x2cd   :  { %3088 = vmatpush.bf16.msra.mxu3 %v4486_v51  ;;  %3075 = vmatpush.bf16.msra.mxu2 %v4422_v48  ;;  %v4558_v51 = vor.u32 %v4979_v30, %v4555_v33  ;;  %v4975_v48 = vld [vmem:[#allocation14 + $0x144] sm:$0xf] }
 0x2ce   :  { %3114 = vmatpush.bf16.msrb.mxu1 %v4614_v27  ;;  %v4542_v58 = vor.u32 %v4975_v48, %v4539_v56 }
 0x2d0   :  { %3100 = vmatpush.bf16.msrb.mxu0 %v4558_v51  ;;  %v4507_v51 = vld [vmem:[#allocation14 + $0x108] sm:$0xf0] }
 0x2d1   :  { %3089 = vmatpush.bf16.msra.mxu3 %v4478_v43  ;;  %3076 = vmatpush.bf16.msra.mxu2 %v4414_v52  ;;  %v4550_v43 = vor.u32 %v4977_v40, %v4547_v42  ;;  %v4985_v52 = vld [vmem:[#allocation14 + $0x194] sm:$0xf] }
 0x2d2   :  { %3115 = vmatpush.bf16.msrb.mxu1 %v4606_v39  ;;  %v4582_v7 = vor.u32 %v4985_v52, %v4579_v5 }
 0x2d4   :  { %3101 = vmatpush.bf16.msrb.mxu0 %v4550_v43 }
 0x2d5   :  { %3090 = vmatpush.bf16.msra.mxu3 %v4470_v31  ;;  %3077 = vmatpush.bf16.msra.mxu2 %v4406_v16  ;;  %v4590_v31 = vor.u32 %v4987_v59, %v4587_v61  ;;  %v4515_v16 = vld [vmem:[#allocation14 + $0x118] sm:$0xf0] }
 0x2d6   :  { %3116 = vmatpush.bf16.msrb.mxu1 %v4598_v46  ;;  %v4518_v26 = vor.u32 %v4969_v15, %v4515_v16 }
 0x2d8   :  { %3102 = vmatpush.bf16.msrb.mxu0 %v4542_v58 }
 0x2d9   :  { %3091 = vmatpush.bf16.msra.mxu3 %v4462_v57  ;;  %3078 = vmatpush.bf16.msra.mxu2 %v4398_v32  ;;  %v4523_v57 = vld [vmem:[#allocation14 + $0x128] sm:$0xf0] }
 0x2da   :  { %3117 = vmatpush.bf16.msrb.mxu1 %v4590_v31  ;;  %v4526_v11 = vor.u32 %v4971_v6, %v4523_v57 }
 0x2dc   :  { %3103 = vmatpush.bf16.msrb.mxu0 %v4534_v50 }
 0x2dd   :  { %3092 = vmatpush.bf16.msra.mxu3 %v4454_v25  ;;  %3079 = vmatpush.bf16.msra.mxu2 %v4390_v41 }
 0x2de   :  { %3118 = vmatpush.bf16.msrb.mxu1 %v4582_v7 }
 0x2e0   :  { %3104 = vmatpush.bf16.msrb.mxu0 %v4526_v11 }
 0x2e1   :  { %3093 = vmatpush.bf16.msra.mxu3 %v4446_v54  ;;  %3080 = vmatpush.bf16.msra.mxu2 %v4382_v55 }
 0x2e2   :  { %3119 = vmatpush.bf16.msrb.mxu1 %v4574_v19 }
 0x2e4   :  { %3105 = vmatpush.bf16.msrb.mxu0 %v4518_v26 }
 0x321   :  { %v2532_v62 = vpop.f32.mrf.mxu0  ;;  %v2545_v60 = vpop.f32.mrf.mxu1 }
 0x322   :  { %v2533_v2 = vadd.f32 %v2532_v62, %v5446_v23  ;;  %v2603_v23 = vperm.slane %v5479_v49, 0 }
 0x324   :  { %v2546_v9 = vadd.f32 %v2545_v60, %v2533_v2  ;;  %v2695_v2 = vld [vmem:[%s5513_s15] sm:$0x3] }
 0x325   :  { %v2697_v52 = vperm.slane %v2695_v2, 0  ;;  %v2698_v6 = vperm.slane %v2695_v2, 1 }
 0x326   :  { %v2612_v12 = vadd.f32 %v2604_v63, %v2546_v9  ;;  %v2506_v13 = vpop.f32.mrf.mxu2  ;;  %v2519_v14 = vpop.f32.mrf.mxu3 }
 0x327   :  { %v2507_v18 = vadd.f32 %v2506_v13, %v5468_v22  ;;  %v4967_v22 = vld [vmem:[#allocation14 + $0x104] sm:$0xf] }
 0x328   :  { %vm2616_vm8 = vcmp.ge.f32.partialorder %v2612_v12, 0.0  ;;  %v2620_v20 = vmul.f32 0.2, %v2612_v12  ;;  %v4510_v36 = vor.u32 %v4967_v22, %v4507_v51 }
 0x329   :  { %v2520_v21 = vadd.f32 %v2519_v14, %v2507_v18  ;;  %v2534_v24 = vpop.f32.mrf.mxu0  ;;  %v2547_v25 = vpop.f32.mrf.mxu1 }
 0x32a   :  { %v2624_v27 = vsel %vm2616_vm8, %v2612_v12, %v2620_v20  ;;  %3106 = vmatpush.bf16.msrb.mxu0 %v4510_v36 }
 0x32b   :  { %v2628_v28 = vpack.c.bf16 %v2624_v27, %v2624_v27  ;;  %v2611_v29 = vadd.f32 %v2603_v23, %v2520_v21 }
 0x32d   :  { %vm2615_vm9 = vcmp.ge.f32.partialorder %v2611_v29, 0.0  ;;  %v2619_v30 = vmul.f32 0.2, %v2611_v29  ;;  %3042 = vmatmul.bf16.vlgmr.msrb.gmra.mxu3 %v2628_v28 }
 0x32e   :  { %v2508_v32 = vpop.f32.mrf.mxu2  ;;  %v2521_v33 = vpop.f32.mrf.mxu3 }
 0x32f   :  { %v2623_v35 = vsel %vm2615_vm9, %v2611_v29, %v2619_v30 }
 0x330   :  { %v2627_v37 = vpack.c.bf16 %v2623_v35, %v2623_v35 }
 0x331   :  { %v2584_v54 = vpop.f32.mrf.mxu0  ;;  %v2597_v38 = vpop.f32.mrf.mxu1 }
 0x332   :  { %v2585_v39 = vadd.f32 %v2584_v54, %v5453_v53  ;;  %3029 = vmatmul.bf16.vlgmr.msrb.gmra.mxu2 %v2627_v37 }
 0x334   :  { %v2598_v34 = vadd.f32 %v2597_v38, %v2585_v39 }
 0x336   :  { %v2614_v40 = vadd.f32 %v2606_v4, %v2598_v34  ;;  %v2558_v41 = vpop.f32.mrf.mxu2  ;;  %v2571_v42 = vpop.f32.mrf.mxu3 }
 0x337   :  { %v2559_v43 = vadd.f32 %v2558_v41, %v5474_v3 }
 0x338   :  { %vm2618_vm10 = vcmp.ge.f32.partialorder %v2614_v40, 0.0  ;;  %v2622_v45 = vmul.f32 0.2, %v2614_v40 }
 0x339   :  { %v2572_v46 = vadd.f32 %v2571_v42, %v2559_v43  ;;  %v2586_v17 = vpop.f32.mrf.mxu0  ;;  %v2599_v47 = vpop.f32.mrf.mxu1 }
 0x33a   :  { %v2626_v48 = vsel %vm2618_vm10, %v2614_v40, %v2622_v45 }
 0x33b   :  { %v2630_v55 = vpack.c.bf16 %v2626_v48, %v2626_v48  ;;  %v2613_v56 = vadd.f32 %v2605_v44, %v2572_v46 }
 0x33d   :  { %vm2617_vm11 = vcmp.ge.f32.partialorder %v2613_v56, 0.0  ;;  %v2621_v53 = vmul.f32 0.2, %v2613_v56  ;;  %3068 = vmatmul.bf16.vlgmr.msra.gmra.mxu1 %v2630_v55  ;;  %3094 = vmatmul.bf16.vlgmr.msra.gmra.mxu3 %v2628_v28 }
 0x33e   :  { %v2560_v58 = vpop.f32.mrf.mxu2  ;;  %v2573_v59 = vpop.f32.mrf.mxu3 }
 0x33f   :  { %v2625_v61 = vsel %vm2617_vm11, %v2613_v56, %v2621_v53 }
 0x340   :  { %v2629_v31 = vpack.c.bf16 %v2625_v61, %v2625_v61 }
 0x342   :  { %3055 = vmatmul.bf16.vlgmr.msra.gmra.mxu0 %v2629_v31  ;;  %3081 = vmatmul.bf16.vlgmr.msra.gmra.mxu2 %v2627_v37 }
 0x34d   :  { %3120 = vmatmul.bf16.vlgmr.msrb.gmra.mxu1 %v2630_v55 }
 0x352   :  { %3107 = vmatmul.bf16.vlgmr.msrb.gmra.mxu0 %v2629_v31 }
 0x3b0   :  { %v3043_v3 = vpop.f32.mrf.mxu3 }
 0x3b5   :  { %v3030_v49 = vpop.f32.mrf.mxu2 }
 0x3b6   :  { %v3031_v57 = vadd.f32 %v3030_v49, %v2697_v52 }
 0x3b8   :  { %v3045_v62 = vpop.f32.mrf.mxu3  ;;  %v3044_v11 = vadd.f32 %v3043_v3, %v3031_v57 }
 0x3ba   :  { %v3069_v60 = vpop.f32.mrf.mxu1 }
 0x3bd   :  { %v3032_v63 = vpop.f32.mrf.mxu2 }
 0x3bf   :  { %v3056_v0 = vpop.f32.mrf.mxu0 }
 0x3c0   :  { %v3095_v1 = vpop.f32.mrf.mxu3  ;;  %v3057_v13 = vadd.f32 %v3056_v0, %v3044_v11 }
 0x3c2   :  { %v3071_v50 = vpop.f32.mrf.mxu1  ;;  %v3070_v18 = vadd.f32 %v3069_v60, %v3057_v13 }
 0x3c5   :  { %v3082_v5 = vpop.f32.mrf.mxu2 }
 0x3c6   :  { %v3083_v8 = vadd.f32 %v3082_v5, %v2698_v6 }
 0x3c7   :  { %v3058_v7 = vpop.f32.mrf.mxu0 }
 0x3c8   :  { %v3097_v9 = vpop.f32.mrf.mxu3  ;;  %v3096_v14 = vadd.f32 %v3095_v1, %v3083_v8 }
 0x3ca   :  { %v3121_v10 = vpop.f32.mrf.mxu1 }
 0x3cd   :  { %v3084_v12 = vpop.f32.mrf.mxu2 }
 0x3cf   :  { %v3108_v15 = vpop.f32.mrf.mxu0 }
 0x3d0   :  { %v3109_v16 = vadd.f32 %v3108_v15, %v3096_v14 }
 0x3d2   :  { %v3122_v23 = vadd.f32 %v3121_v10, %v3109_v16  ;;  %v3123_v19 = vpop.f32.mrf.mxu1 }
 0x3d4   :  { %5015 = vtanh.f32 %v3122_v23 }
 0x3d5   :  { %5017 = vtanh.f32 %v3070_v18 }
 0x3d7   :  { %v3110_v20 = vpop.f32.mrf.mxu0 }
 0x3da   :  { %v5016_v21 = vpop.eup %5015 }
 0x3db   :  { %v3129_v24 = vrot.slane %v5016_v21, 6  ;;  %v5018_v25 = vpop.eup %5017 }
 0x3dd   :  { %v3131_v26 = vsel %vm3130_vm12, %v5018_v25, %v3129_v24 }
 0x3de   :  { %3133 = vst [vmem:[%s5514_s16] sm:$0xf] %v3131_v26 }
 0x3df   :  { %5245 = dma.done.wait [#allocation4], 32  }
 0x3e0   :  { %5246 = vsyncadd [#allocation4], 4294967264 }
 0x3e1   :  { %3153 = vsyncpa [#allocation3], 1 }
 0x3e2   :  { %3154 = vsyncpa [#allocation6], 1 }
 0x3e3   :  { %3155 = vsyncpa [#allocation9], 1 }
 0x3e4   :  { %3156 = vsyncpa [#allocation12], 1 }
 0x3e5   :  { %3157 = vsyncpa [#allocation15], 1 }
 0x3e6   :  { %3158 = vsyncpa [#allocation4], 1 }

</bundles_post_ra>
